<compile_context>
chip_gen: v5e
topology: v5e:2x2
jax: 0.10.0
libtpu: 0.0.40
codegen_flags: <defaults>
</compile_context>

<pallas_src>
import math
import functools

import jax
import jax.numpy as jnp
from jax.experimental import pallas as pl
from jax.experimental.pallas import tpu as pltpu

INPUT_DIM = 12
HIDDEN_DIM = 128
OUTPUT_DIM = 2
ROW_PAD = 128            # pad node count to a multiple of the MXU/lane tile


def _round_up(n, m):
    return ((n + m - 1) // m) * m


# -----------------------------------------------------------------------------
# Kernel: one graph per grid step.  All matmuls are 128-K bf16 MXU pushes with
# f32 accumulation; activations are carried in bf16 between layers.
# -----------------------------------------------------------------------------
def policy_gcn_kernel(x_ref, adj_ref, w_ref, b_ref, out_ref):
    f32, bf16 = jnp.float32, jnp.bfloat16

    adj = adj_ref[0]          # [N_pad, N_pad] bf16
    b = b_ref[...]            # [8, 128]  f32
    # bias rows: 0=c1 (folded scaler), 1=gb1, 2=gb2, 3=gb3,
    #            4=ab1, 5=ab2, 6=ab3, 7=ab4 (padded to 128 lanes)
    # weight slots: 0=gw1' (scaler-folded, K-padded), 1=gw2, 2=gw3,
    #               3=aw1, 4=aw2, 5=aw3, 6=aw4 (lane-padded)

    def gcn(h_bf, w_idx, supp_bias_row, out_bias_row):
        supp = jnp.dot(h_bf, w_ref[w_idx], preferred_element_type=f32)
        if supp_bias_row is not None:            # layer-1 scaler-fold constant:
            supp = supp + b[supp_bias_row:supp_bias_row + 1, :]   # added BEFORE adj
        agg = jnp.dot(adj, supp.astype(bf16), preferred_element_type=f32)
        return jnp.maximum(agg + b[out_bias_row:out_bias_row + 1, :], 0.0).astype(bf16)

    def dense(h_bf, w_idx, bias_row, relu=True):
        out = jnp.dot(h_bf, w_ref[w_idx], preferred_element_type=f32)
        out = out + b[bias_row:bias_row + 1, :]
        return jnp.maximum(out, 0.0).astype(bf16) if relu else out

    # --- GCN layers (StandardScaler folded into slot 0 / bias row 0) ---
    h = gcn(x_ref[0], 0, 0, 1)
    h = gcn(h, 1, None, 2)
    h = gcn(h, 2, None, 3)

    # --- action_net: 3x (Linear + ReLU) + final Linear (128-lane padded) ---
    h = dense(h, 3, 4)
    h = dense(h, 4, 5)
    h = dense(h, 5, 6)
    out_ref[0] = dense(h, 6, 7, relu=False).astype(out_ref.dtype)


# -----------------------------------------------------------------------------
# Wrapper
# -----------------------------------------------------------------------------
_VMEM_CAP = None


def _vmem_capacity_bytes():
    """Physical VMEM per core, generation-aware (128 MiB v5e/v6e, 64 MiB v7x)."""
    global _VMEM_CAP
    if _VMEM_CAP is None:
        cap = None
        try:
            cap = getattr(pltpu.get_tpu_info(), "vmem_capacity_bytes", None)
        except Exception:
            cap = None
        _VMEM_CAP = int(cap) if cap else (128 << 20)
    return _VMEM_CAP


def _prepare_params(params):
    """Fold the StandardScaler into layer 1 and coalesce all weights/biases."""
    f32, bf16 = jnp.float32, jnp.bfloat16
    inv_scale = 1.0 / params["scale"]                               # [1, 12]
    gw1_fold = params["gw1"] * inv_scale.reshape(INPUT_DIM, 1)      # [12, 128]
    c1 = -(params["mean"] * inv_scale) @ params["gw1"]              # [1, 128]

    gw1_pad = jnp.zeros((HIDDEN_DIM, HIDDEN_DIM), f32).at[:INPUT_DIM, :].set(gw1_fold)
    aw4_pad = jnp.zeros((HIDDEN_DIM, HIDDEN_DIM), f32).at[:, :OUTPUT_DIM].set(params["aw4"])
    ab4_pad = jnp.zeros((1, HIDDEN_DIM), f32).at[:, :OUTPUT_DIM].set(params["ab4"])

    w_stack = jnp.stack(
        [gw1_pad, params["gw2"], params["gw3"],
         params["aw1"], params["aw2"], params["aw3"], aw4_pad], axis=0
    ).astype(bf16)                                                  # [7,128,128] bf16
    b_stack = jnp.concatenate(
        [c1, params["gb1"], params["gb2"], params["gb3"],
         params["ab1"], params["ab2"], params["ab3"], ab4_pad], axis=0
    ).astype(f32)                                                   # [8,128] f32
    return w_stack, b_stack


@jax.jit
def policy_gcn_forward_batched(x_b, adj_b, params):
    """x_b: [B, N, 12] f32.  adj_b: [B, N, N] f32 or pre-padded [B, N_pad, N_pad]
    bf16.  Returns [B, N, 2] f32 scores (padded graphs are independent)."""
    f32, bf16 = jnp.float32, jnp.bfloat16
    bsz, n = x_b.shape[0], x_b.shape[1]
    n_pad = max(ROW_PAD, _round_up(n, ROW_PAD))

    # Pad node features to (n_pad rows, 128 feature lanes); the extra columns
    # meet the zero rows of the padded gw1', contributing exact zeros.
    x_p = jnp.pad(x_b.astype(f32),
                  ((0, 0), (0, n_pad - n), (0, HIDDEN_DIM - INPUT_DIM))).astype(bf16)

    if adj_b.shape[1] == n_pad and adj_b.dtype == bf16:
        adj_p = adj_b                     # built pre-padded + bf16 upstream (preferred)
    else:
        adj_p = jnp.pad(adj_b.astype(f32),
                        ((0, 0), (0, n_pad - adj_b.shape[1]),
                         (0, n_pad - adj_b.shape[2]))).astype(bf16)

    w_stack, b_stack = _prepare_params(params)

    # VMEM budget: block buffers (double-buffered across the batch grid) +
    # resident weights + live activations, capped at ~80% of physical VMEM.
    cap = _vmem_capacity_bytes()
    need = (2 * n_pad * n_pad * 2                    # adj block (bf16) x2 buffers
            + 2 * n_pad * HIDDEN_DIM * 2             # x block (bf16)
            + 2 * n_pad * HIDDEN_DIM * 4             # out block (f32)
            + 2 * w_stack.size * 2 + 2 * b_stack.size * 4
            + 6 * n_pad * HIDDEN_DIM * 4)            # in-kernel temporaries
    vmem_limit = int(min(0.8 * cap, max(need + (8 << 20), 32 << 20)))

    out = pl.pallas_call(
        policy_gcn_kernel,
        out_shape=jax.ShapeDtypeStruct((bsz, n_pad, HIDDEN_DIM), f32),
        grid=(bsz,),
        in_specs=[
            pl.BlockSpec((1, n_pad, HIDDEN_DIM), lambda g: (g, 0, 0)),   # x
            pl.BlockSpec((1, n_pad, n_pad), lambda g: (g, 0, 0)),        # adj
            pl.BlockSpec((7, HIDDEN_DIM, HIDDEN_DIM), lambda g: (0, 0, 0)),
            pl.BlockSpec((8, HIDDEN_DIM), lambda g: (0, 0)),
        ],
        out_specs=pl.BlockSpec((1, n_pad, HIDDEN_DIM), lambda g: (g, 0, 0)),
        compiler_params=pltpu.CompilerParams(
            dimension_semantics=("parallel",),       # graphs split across TCs (v7x)
            vmem_limit_bytes=vmem_limit),
    )(x_p, adj_p, w_stack, b_stack)

    return out[:, :n, :OUTPUT_DIM]


def policy_gcn_forward(x, adj, params):
    """Single graph (PyTorch-module-style API): x [N,12], adj dense -> [N,2]."""
    return policy_gcn_forward_batched(x[None], adj[None], params)[0]


# -----------------------------------------------------------------------------
# Parameter / input construction + references
# -----------------------------------------------------------------------------
def _uniform(key, shape, bound):
    return jax.random.uniform(key, shape, dtype=jnp.float32, minval=-bound, maxval=bound)


def init_params(key):
    keys = jax.random.split(key, 16)
    params = {}
    params["mean"] = jax.random.normal(keys[0], (1, INPUT_DIM), dtype=jnp.float32)
    params["scale"] = 0.5 + jax.random.uniform(keys[1], (1, INPUT_DIM), dtype=jnp.float32)

    stdv = 1.0 / math.sqrt(HIDDEN_DIM)
    params["gw1"] = _uniform(keys[2], (INPUT_DIM, HIDDEN_DIM), stdv)
    params["gb1"] = _uniform(keys[3], (1, HIDDEN_DIM), stdv)
    params["gw2"] = _uniform(keys[4], (HIDDEN_DIM, HIDDEN_DIM), stdv)
    params["gb2"] = _uniform(keys[5], (1, HIDDEN_DIM), stdv)
    params["gw3"] = _uniform(keys[6], (HIDDEN_DIM, HIDDEN_DIM), stdv)
    params["gb3"] = _uniform(keys[7], (1, HIDDEN_DIM), stdv)

    bound_h = 1.0 / math.sqrt(HIDDEN_DIM)
    params["aw1"] = _uniform(keys[8], (HIDDEN_DIM, HIDDEN_DIM), bound_h)
    params["ab1"] = _uniform(keys[9], (1, HIDDEN_DIM), bound_h)
    params["aw2"] = _uniform(keys[10], (HIDDEN_DIM, HIDDEN_DIM), bound_h)
    params["ab2"] = _uniform(keys[11], (1, HIDDEN_DIM), bound_h)
    params["aw3"] = _uniform(keys[12], (HIDDEN_DIM, HIDDEN_DIM), bound_h)
    params["ab3"] = _uniform(keys[13], (1, HIDDEN_DIM), bound_h)
    params["aw4"] = _uniform(keys[14], (HIDDEN_DIM, OUTPUT_DIM), bound_h)
    params["ab4"] = _uniform(keys[15], (1, OUTPUT_DIM), bound_h)
    return params


def edges_to_dense_adj(src, dst, w, n, n_pad=None, dtype=jnp.float32):
    """Dense equivalent of torch.sparse.FloatTensor(indices, weights, (n, n)).
    Optionally built directly at the padded size / storage dtype the kernel
    consumes, avoiding a separate N^2 pad+cast pass in the wrapper."""
    size = n if n_pad is None else n_pad
    adj = jnp.zeros((size, size), jnp.float32).at[src, dst].add(w)
    return adj.astype(dtype)


def reference_forward_f32(x, adj, params):
    """Pure f32 JAX reference (original PyTorch semantics)."""
    h = (x - params["mean"]) / params["scale"]
    for wn, bn in (("gw1", "gb1"), ("gw2", "gb2"), ("gw3", "gb3")):
        h = jnp.maximum(adj @ (h @ params[wn]) + params[bn], 0.0)
    for wn, bn in (("aw1", "ab1"), ("aw2", "ab2"), ("aw3", "ab3")):
        h = jnp.maximum(h @ params[wn] + params[bn], 0.0)
    return h @ params["aw4"] + params["ab4"]


def reference_forward_matched(x, adj, params):
    """Mirrors the kernel's numerics: scaler fold, bf16 MXU inputs, bf16
    activations after each ReLU, f32 accumulation + f32 bias adds."""
    f32, bf16 = jnp.float32, jnp.bfloat16
    inv_scale = 1.0 / params["scale"]
    gw1_fold = params["gw1"] * inv_scale.reshape(INPUT_DIM, 1)
    c1 = -(params["mean"] * inv_scale) @ params["gw1"]
    adj_bf = adj.astype(bf16)

    def mm(a, w):
        return jnp.dot(a.astype(bf16), w.astype(bf16), preferred_element_type=f32)

    supp = mm(x, gw1_fold) + c1
    h = jnp.maximum(jnp.dot(adj_bf, supp.astype(bf16), preferred_element_type=f32)
                    + params["gb1"], 0.0).astype(bf16)
    for wn, bn in (("gw2", "gb2"), ("gw3", "gb3")):
        supp = mm(h, params[wn])
        h = jnp.maximum(jnp.dot(adj_bf, supp.astype(bf16), preferred_element_type=f32)
                        + params[bn], 0.0).astype(bf16)
    for wn, bn in (("aw1", "ab1"), ("aw2", "ab2"), ("aw3", "ab3")):
        h = jnp.maximum(mm(h, params[wn]) + params[bn], 0.0).astype(bf16)
    return mm(h, params["aw4"]) + params["ab4"]


# -----------------------------------------------------------------------------
# Demo / correctness check
# -----------------------------------------------------------------------------
if __name__ == "__main__":
    key = jax.random.PRNGKey(0)
    k_param, k_graphs = jax.random.split(key, 2)

    N = 64
    NUM_EDGES = 192
    N_PAD = max(ROW_PAD, _round_up(N, ROW_PAD))

    params = init_params(k_param)

    def make_graph(k):
        kx, ks, kd, kw = jax.random.split(k, 4)
        x = jax.random.normal(kx, (N, INPUT_DIM), dtype=jnp.float32)
        src = jax.random.randint(ks, (NUM_EDGES,), 0, N)
        dst = jax.random.randint(kd, (NUM_EDGES,), 0, N)
        w = jax.random.uniform(kw, (NUM_EDGES,), dtype=jnp.float32)
        # Build adj pre-padded and in bf16 — the exact layout the kernel consumes.
        adj_pad = edges_to_dense_adj(src, dst, w, N, n_pad=N_PAD, dtype=jnp.bfloat16)
        return x, adj_pad

    graphs = [make_graph(k) for k in jax.random.split(k_graphs, 2)]

    # ---- single-graph path (matches the PyTorch module's per-call API) ----
    x0, adj0_pad = graphs[0]
    scores = jax.block_until_ready(policy_gcn_forward(x0, adj0_pad, params))
    assert scores.shape == (N, OUTPUT_DIM), scores.shape

    adj0_f32 = adj0_pad[:N, :N].astype(jnp.float32)
    ref_match = reference_forward_matched(x0, adj0_f32, params)
    err_m = float(jnp.max(jnp.abs(scores - ref_match)))
    assert jnp.allclose(scores, ref_match, atol=2e-2, rtol=2e-2), err_m

    # Sanity vs. original f32 semantics (loose: bf16 adj/x/activations on MXU).
    ref_f32 = reference_forward_f32(x0, adj0_f32, params)
    err_f = float(jnp.max(jnp.abs(scores - ref_f32)))
    assert jnp.allclose(scores, ref_f32, atol=1.5e-1, rtol=1.5e-1), err_f

    # ---- batched path: B graphs per call, "parallel" batch axis (v7x 2x TC) ----
    x_b = jnp.stack([g[0] for g in graphs], axis=0)
    adj_b = jnp.stack([g[1] for g in graphs], axis=0)
    scores_b = jax.block_until_ready(policy_gcn_forward_batched(x_b, adj_b, params))
    assert scores_b.shape == (2, N, OUTPUT_DIM), scores_b.shape
    for i, (xg, adjg) in enumerate(graphs):
        ref_i = reference_forward_matched(xg, adjg[:N, :N].astype(jnp.float32), params)
        err_i = float(jnp.max(jnp.abs(scores_b[i] - ref_i)))
        assert jnp.allclose(scores_b[i], ref_i, atol=2e-2, rtol=2e-2), err_i

    print("KERNEL_OK")
</pallas_src>

<mosaic_0001>
module attributes {stable_mosaic.version = 11 : i64} {
  func.func @policy_gcn_kernel(%arg0: i32, %arg1: memref<1x128x128xbf16, #tpu.memory_space<vmem>>, %arg2: memref<1x128x128xbf16, #tpu.memory_space<vmem>>, %arg3: memref<7x128x128xbf16, #tpu.memory_space<vmem>>, %arg4: memref<8x128xf32, #tpu.memory_space<vmem>>, %arg5: memref<1x128x128xf32, #tpu.memory_space<vmem>>) attributes {dimension_semantics = [#tpu.dimension_semantics<parallel>], iteration_bounds = array<i64: 1>, scalar_prefetch = 0 : i64, scratch_operands = 0 : i64, tpu.core_type = #tpu.core_type<tc>, window_params = [{transform_indices = @transform_0, window_bounds = array<i64: 1, 128, 128>}, {transform_indices = @transform_1, window_bounds = array<i64: 1, 128, 128>}, {pipeline_mode = #tpu.pipeline_mode<synchronous>, transform_indices = @transform_2, window_bounds = array<i64: 7, 128, 128>}, {pipeline_mode = #tpu.pipeline_mode<synchronous>, transform_indices = @transform_3, window_bounds = array<i64: 8, 128>}, {transform_indices = @transform_4, window_bounds = array<i64: 1, 128, 128>}]} {
    %c0 = arith.constant 0 : index
    %c0_0 = arith.constant 0 : index
    %c0_1 = arith.constant 0 : index
    %0 = vector.load %arg2[%c0, %c0_0, %c0_1] : memref<1x128x128xbf16, #tpu.memory_space<vmem>>, vector<1x128x128xbf16>
    %1 = vector.shape_cast %0 : vector<1x128x128xbf16> to vector<128x128xbf16>
    %c0_2 = arith.constant 0 : index
    %c0_3 = arith.constant 0 : index
    %2 = vector.load %arg4[%c0_2, %c0_3] : memref<8x128xf32, #tpu.memory_space<vmem>>, vector<8x128xf32>
    %c0_4 = arith.constant 0 : index
    %c0_5 = arith.constant 0 : index
    %c0_6 = arith.constant 0 : index
    %3 = vector.load %arg1[%c0_4, %c0_5, %c0_6] : memref<1x128x128xbf16, #tpu.memory_space<vmem>>, vector<1x128x128xbf16>
    %4 = vector.shape_cast %3 : vector<1x128x128xbf16> to vector<128x128xbf16>
    %c0_7 = arith.constant 0 : index
    %c0_8 = arith.constant 0 : index
    %c0_9 = arith.constant 0 : index
    %5 = vector.load %arg3[%c0_7, %c0_8, %c0_9] : memref<7x128x128xbf16, #tpu.memory_space<vmem>>, vector<1x128x128xbf16>
    %6 = vector.shape_cast %5 : vector<1x128x128xbf16> to vector<128x128xbf16>
    %cst = arith.constant dense<0.000000e+00> : vector<128x128xf32>
    %7 = tpu.matmul %4, %6, %cst {dimension_numbers = #tpu.dot_dimension_numbers<[1], [0], [0], [1], [0, 0, 1, 1], [], []>} : vector<128x128xbf16>, vector<128x128xbf16>, vector<128x128xf32> -> vector<128x128xf32>
    %8 = vector.extract_strided_slice %2 {offsets = [0, 0], sizes = [1, 128], strides = [1, 1]} : vector<8x128xf32> to vector<1x128xf32>
    %9 = vector.broadcast %8 : vector<1x128xf32> to vector<128x128xf32>
    %10 = arith.addf %7, %9 : vector<128x128xf32>
    %11 = arith.truncf %10 : vector<128x128xf32> to vector<128x128xbf16>
    %cst_10 = arith.constant dense<0.000000e+00> : vector<128x128xf32>
    %12 = tpu.matmul %1, %11, %cst_10 {dimension_numbers = #tpu.dot_dimension_numbers<[1], [0], [0], [1], [0, 0, 1, 1], [], []>} : vector<128x128xbf16>, vector<128x128xbf16>, vector<128x128xf32> -> vector<128x128xf32>
    %13 = vector.extract_strided_slice %2 {offsets = [1, 0], sizes = [1, 128], strides = [1, 1]} : vector<8x128xf32> to vector<1x128xf32>
    %14 = vector.broadcast %13 : vector<1x128xf32> to vector<128x128xf32>
    %15 = arith.addf %12, %14 : vector<128x128xf32>
    %cst_11 = arith.constant 0.000000e+00 : f32
    %16 = vector.broadcast %cst_11 : f32 to vector<128x128xf32>
    %17 = arith.maximumf %15, %16 : vector<128x128xf32>
    %18 = arith.truncf %17 : vector<128x128xf32> to vector<128x128xbf16>
    %c1 = arith.constant 1 : index
    %c0_12 = arith.constant 0 : index
    %c0_13 = arith.constant 0 : index
    %19 = vector.load %arg3[%c1, %c0_12, %c0_13] : memref<7x128x128xbf16, #tpu.memory_space<vmem>>, vector<1x128x128xbf16>
    %20 = vector.shape_cast %19 : vector<1x128x128xbf16> to vector<128x128xbf16>
    %cst_14 = arith.constant dense<0.000000e+00> : vector<128x128xf32>
    %21 = tpu.matmul %18, %20, %cst_14 {dimension_numbers = #tpu.dot_dimension_numbers<[1], [0], [0], [1], [0, 0, 1, 1], [], []>} : vector<128x128xbf16>, vector<128x128xbf16>, vector<128x128xf32> -> vector<128x128xf32>
    %22 = arith.truncf %21 : vector<128x128xf32> to vector<128x128xbf16>
    %cst_15 = arith.constant dense<0.000000e+00> : vector<128x128xf32>
    %23 = tpu.matmul %1, %22, %cst_15 {dimension_numbers = #tpu.dot_dimension_numbers<[1], [0], [0], [1], [0, 0, 1, 1], [], []>} : vector<128x128xbf16>, vector<128x128xbf16>, vector<128x128xf32> -> vector<128x128xf32>
    %24 = vector.extract_strided_slice %2 {offsets = [2, 0], sizes = [1, 128], strides = [1, 1]} : vector<8x128xf32> to vector<1x128xf32>
    %25 = vector.broadcast %24 : vector<1x128xf32> to vector<128x128xf32>
    %26 = arith.addf %23, %25 : vector<128x128xf32>
    %cst_16 = arith.constant 0.000000e+00 : f32
    %27 = vector.broadcast %cst_16 : f32 to vector<128x128xf32>
    %28 = arith.maximumf %26, %27 : vector<128x128xf32>
    %29 = arith.truncf %28 : vector<128x128xf32> to vector<128x128xbf16>
    %c2 = arith.constant 2 : index
    %c0_17 = arith.constant 0 : index
    %c0_18 = arith.constant 0 : index
    %30 = vector.load %arg3[%c2, %c0_17, %c0_18] : memref<7x128x128xbf16, #tpu.memory_space<vmem>>, vector<1x128x128xbf16>
    %31 = vector.shape_cast %30 : vector<1x128x128xbf16> to vector<128x128xbf16>
    %cst_19 = arith.constant dense<0.000000e+00> : vector<128x128xf32>
    %32 = tpu.matmul %29, %31, %cst_19 {dimension_numbers = #tpu.dot_dimension_numbers<[1], [0], [0], [1], [0, 0, 1, 1], [], []>} : vector<128x128xbf16>, vector<128x128xbf16>, vector<128x128xf32> -> vector<128x128xf32>
    %33 = arith.truncf %32 : vector<128x128xf32> to vector<128x128xbf16>
    %cst_20 = arith.constant dense<0.000000e+00> : vector<128x128xf32>
    %34 = tpu.matmul %1, %33, %cst_20 {dimension_numbers = #tpu.dot_dimension_numbers<[1], [0], [0], [1], [0, 0, 1, 1], [], []>} : vector<128x128xbf16>, vector<128x128xbf16>, vector<128x128xf32> -> vector<128x128xf32>
    %35 = vector.extract_strided_slice %2 {offsets = [3, 0], sizes = [1, 128], strides = [1, 1]} : vector<8x128xf32> to vector<1x128xf32>
    %36 = vector.broadcast %35 : vector<1x128xf32> to vector<128x128xf32>
    %37 = arith.addf %34, %36 : vector<128x128xf32>
    %cst_21 = arith.constant 0.000000e+00 : f32
    %38 = vector.broadcast %cst_21 : f32 to vector<128x128xf32>
    %39 = arith.maximumf %37, %38 : vector<128x128xf32>
    %40 = arith.truncf %39 : vector<128x128xf32> to vector<128x128xbf16>
    %c3 = arith.constant 3 : index
    %c0_22 = arith.constant 0 : index
    %c0_23 = arith.constant 0 : index
    %41 = vector.load %arg3[%c3, %c0_22, %c0_23] : memref<7x128x128xbf16, #tpu.memory_space<vmem>>, vector<1x128x128xbf16>
    %42 = vector.shape_cast %41 : vector<1x128x128xbf16> to vector<128x128xbf16>
    %cst_24 = arith.constant dense<0.000000e+00> : vector<128x128xf32>
    %43 = tpu.matmul %40, %42, %cst_24 {dimension_numbers = #tpu.dot_dimension_numbers<[1], [0], [0], [1], [0, 0, 1, 1], [], []>} : vector<128x128xbf16>, vector<128x128xbf16>, vector<128x128xf32> -> vector<128x128xf32>
    %44 = vector.extract_strided_slice %2 {offsets = [4, 0], sizes = [1, 128], strides = [1, 1]} : vector<8x128xf32> to vector<1x128xf32>
    %45 = vector.broadcast %44 : vector<1x128xf32> to vector<128x128xf32>
    %46 = arith.addf %43, %45 : vector<128x128xf32>
    %cst_25 = arith.constant 0.000000e+00 : f32
    %47 = vector.broadcast %cst_25 : f32 to vector<128x128xf32>
    %48 = arith.maximumf %46, %47 : vector<128x128xf32>
    %49 = arith.truncf %48 : vector<128x128xf32> to vector<128x128xbf16>
    %c4 = arith.constant 4 : index
    %c0_26 = arith.constant 0 : index
    %c0_27 = arith.constant 0 : index
    %50 = vector.load %arg3[%c4, %c0_26, %c0_27] : memref<7x128x128xbf16, #tpu.memory_space<vmem>>, vector<1x128x128xbf16>
    %51 = vector.shape_cast %50 : vector<1x128x128xbf16> to vector<128x128xbf16>
    %cst_28 = arith.constant dense<0.000000e+00> : vector<128x128xf32>
    %52 = tpu.matmul %49, %51, %cst_28 {dimension_numbers = #tpu.dot_dimension_numbers<[1], [0], [0], [1], [0, 0, 1, 1], [], []>} : vector<128x128xbf16>, vector<128x128xbf16>, vector<128x128xf32> -> vector<128x128xf32>
    %53 = vector.extract_strided_slice %2 {offsets = [5, 0], sizes = [1, 128], strides = [1, 1]} : vector<8x128xf32> to vector<1x128xf32>
    %54 = vector.broadcast %53 : vector<1x128xf32> to vector<128x128xf32>
    %55 = arith.addf %52, %54 : vector<128x128xf32>
    %cst_29 = arith.constant 0.000000e+00 : f32
    %56 = vector.broadcast %cst_29 : f32 to vector<128x128xf32>
    %57 = arith.maximumf %55, %56 : vector<128x128xf32>
    %58 = arith.truncf %57 : vector<128x128xf32> to vector<128x128xbf16>
    %c5 = arith.constant 5 : index
    %c0_30 = arith.constant 0 : index
    %c0_31 = arith.constant 0 : index
    %59 = vector.load %arg3[%c5, %c0_30, %c0_31] : memref<7x128x128xbf16, #tpu.memory_space<vmem>>, vector<1x128x128xbf16>
    %60 = vector.shape_cast %59 : vector<1x128x128xbf16> to vector<128x128xbf16>
    %cst_32 = arith.constant dense<0.000000e+00> : vector<128x128xf32>
    %61 = tpu.matmul %58, %60, %cst_32 {dimension_numbers = #tpu.dot_dimension_numbers<[1], [0], [0], [1], [0, 0, 1, 1], [], []>} : vector<128x128xbf16>, vector<128x128xbf16>, vector<128x128xf32> -> vector<128x128xf32>
    %62 = vector.extract_strided_slice %2 {offsets = [6, 0], sizes = [1, 128], strides = [1, 1]} : vector<8x128xf32> to vector<1x128xf32>
    %63 = vector.broadcast %62 : vector<1x128xf32> to vector<128x128xf32>
    %64 = arith.addf %61, %63 : vector<128x128xf32>
    %cst_33 = arith.constant 0.000000e+00 : f32
    %65 = vector.broadcast %cst_33 : f32 to vector<128x128xf32>
    %66 = arith.maximumf %64, %65 : vector<128x128xf32>
    %67 = arith.truncf %66 : vector<128x128xf32> to vector<128x128xbf16>
    %c6 = arith.constant 6 : index
    %c0_34 = arith.constant 0 : index
    %c0_35 = arith.constant 0 : index
    %68 = vector.load %arg3[%c6, %c0_34, %c0_35] : memref<7x128x128xbf16, #tpu.memory_space<vmem>>, vector<1x128x128xbf16>
    %69 = vector.shape_cast %68 : vector<1x128x128xbf16> to vector<128x128xbf16>
    %cst_36 = arith.constant dense<0.000000e+00> : vector<128x128xf32>
    %70 = tpu.matmul %67, %69, %cst_36 {dimension_numbers = #tpu.dot_dimension_numbers<[1], [0], [0], [1], [0, 0, 1, 1], [], []>} : vector<128x128xbf16>, vector<128x128xbf16>, vector<128x128xf32> -> vector<128x128xf32>
    %71 = vector.extract_strided_slice %2 {offsets = [7, 0], sizes = [1, 128], strides = [1, 1]} : vector<8x128xf32> to vector<1x128xf32>
    %72 = vector.broadcast %71 : vector<1x128xf32> to vector<128x128xf32>
    %73 = arith.addf %70, %72 : vector<128x128xf32>
    %c0_37 = arith.constant 0 : index
    %c0_38 = arith.constant 0 : index
    %c0_39 = arith.constant 0 : index
    %74 = vector.load %arg5[%c0_37, %c0_38, %c0_39] : memref<1x128x128xf32, #tpu.memory_space<vmem>>, vector<1x128x128xf32>
    %75 = vector.shape_cast %74 : vector<1x128x128xf32> to vector<128x128xf32>
    %76 = vector.shape_cast %73 : vector<128x128xf32> to vector<1x128x128xf32>
    tpu.vector_store %arg5[%c0_37, %c0_38, %c0_39], %76 {strides = array<i32>} : memref<1x128x128xf32, #tpu.memory_space<vmem>>, vector<1x128x128xf32>,
    return
  }
  func.func @transform_0(%arg0: i32) -> (i32, i32, i32) {
    %c0_i32 = arith.constant 0 : i32
    %c0_i32_0 = arith.constant 0 : i32
    %c0_i32_1 = arith.constant 0 : i32
    return %arg0, %c0_i32, %c0_i32_0 : i32, i32, i32
  }
  func.func @transform_1(%arg0: i32) -> (i32, i32, i32) {
    %c0_i32 = arith.constant 0 : i32
    %c0_i32_0 = arith.constant 0 : i32
    %c0_i32_1 = arith.constant 0 : i32
    return %arg0, %c0_i32, %c0_i32_0 : i32, i32, i32
  }
  func.func @transform_2(%arg0: i32) -> (i32, i32, i32) {
    %c0_i32 = arith.constant 0 : i32
    %c0_i32_0 = arith.constant 0 : i32
    %c0_i32_1 = arith.constant 0 : i32
    %c0_i32_2 = arith.constant 0 : i32
    return %c0_i32, %c0_i32_0, %c0_i32_1 : i32, i32, i32
  }
  func.func @transform_3(%arg0: i32) -> (i32, i32) {
    %c0_i32 = arith.constant 0 : i32
    %c0_i32_0 = arith.constant 0 : i32
    %c0_i32_1 = arith.constant 0 : i32
    return %c0_i32, %c0_i32_0 : i32, i32
  }
  func.func @transform_4(%arg0: i32) -> (i32, i32, i32) {
    %c0_i32 = arith.constant 0 : i32
    %c0_i32_0 = arith.constant 0 : i32
    %c0_i32_1 = arith.constant 0 : i32
    return %arg0, %c0_i32, %c0_i32_0 : i32, i32, i32
  }
}

</mosaic_0001>

<bundles_post_ra>
// kernel: policy_gcn_forward_batched.1
= control target key start
LH: loop header
LB: loop body
LE: loop exit
PB: predicated region body
PF: predicated region fallthrough
CT: control target
= control target key end

     0   :  { %s2160_s2 = inlined_call_operand.vmem [shape: bf16[7,128,128], index: 2, kind: input, shape index: {}]   ;;  %s2161_s0 = inlined_call_operand.vmem [shape: bf16[1,128,128], index: 0, kind: input, shape index: {}]   ;;  %s2162_s3 = inlined_call_operand.vmem [shape: f32[8,128], index: 3, kind: input, shape index: {}]   ;;  %s2163_s1 = inlined_call_operand.vmem [shape: bf16[1,128,128], index: 1, kind: input, shape index: {}]   ;;  %s2164_s4 = inlined_call_operand.vmem [shape: f32[1,128,128], index: 4, kind: output, shape index: {}]  }
   0x1   :  { %v1693_v0 = vld [vmem:[%s2160_s2 + $0x38] sm:$0xff]  ;;  %v1692_v1 = vld [vmem:[%s2160_s2 + $0x30] sm:$0xff]  ;;  %v1691_v2 = vld [vmem:[%s2160_s2 + $0x28] sm:$0xff] }
   0x2   :  { %1742 = vmatpush.bf16.msra.mxu2 %v1693_v0  ;;  %163 = vmatpush.bf16.msra.mxu0 %v1693_v0  ;;  %v1690_v3 = vld [vmem:[%s2160_s2 + $0x20] sm:$0xff]  ;;  %v1689_v4 = vld [vmem:[%s2160_s2 + $0x18] sm:$0xff]  ;;  %v1688_v5 = vld [vmem:[%s2160_s2 + $0x10] sm:$0xff] }
   0x3   :  { %v1687_v6 = vld [vmem:[%s2160_s2 + $0x8] sm:$0xff]  ;;  %v1686_v7 = vld [vmem:[%s2160_s2] sm:$0xff]  ;;  %v1684_v12 = vld [vmem:[%s2161_s0 + $0x30] sm:$0xff] }
   0x4   :  { %v1682_v8 = vld [vmem:[%s2161_s0 + $0x20] sm:$0xff]  ;;  %v1683_v10 = vld [vmem:[%s2161_s0 + $0x28] sm:$0xff]  ;;  %v1680_v13 = vld [vmem:[%s2161_s0 + $0x10] sm:$0xff] }
   0x5   :  { %v1678_v9 = vld [vmem:[%s2161_s0] sm:$0xff]  ;;  %v1679_v11 = vld [vmem:[%s2161_s0 + $0x8] sm:$0xff]  ;;  %v1685_v14 = vld [vmem:[%s2161_s0 + $0x38] sm:$0xff] }
   0x6   :  { %1743 = vmatpush.bf16.msra.mxu2 %v1692_v1  ;;  %164 = vmatpush.bf16.msra.mxu0 %v1692_v1  ;;  %v1681_v15 = vld [vmem:[%s2161_s0 + $0x18] sm:$0xff]  ;;  %v1835_v29 = vld [vmem:[%s2162_s3] sm:$0xff]  ;;  %v1847_v59 = vld [vmem:[%s2163_s1 + $0x8] sm:$0xff] }
   0x7   :  { %v66_v30 = vperm.slane %v1835_v29, 0  ;;  %v1841_v58 = vld [vmem:[%s2163_s1] sm:$0xff]  ;;  %v1859_v61 = vld [vmem:[%s2163_s1 + $0x10] sm:$0xff]  ;;  %v1864_v62 = vld [vmem:[%s2163_s1 + $0x28] sm:$0xff] }
   0x8   :  { %v1853_v60 = vld [vmem:[%s2163_s1 + $0x20] sm:$0xff]  ;;  %v1701_v63 = vld [vmem:[%s2160_s2 + $0x78] sm:$0xff]  ;;  %v1700_v0 = vld [vmem:[%s2160_s2 + $0x70] sm:$0xff] }
   0x9   :  { %v1699_v1 = vld [vmem:[%s2160_s2 + $0x68] sm:$0xff] }
   0xa   :  { %1744 = vmatpush.bf16.msra.mxu2 %v1691_v2  ;;  %165 = vmatpush.bf16.msra.mxu0 %v1691_v2  ;;  %v1880_v2 = vld [vmem:[%s2163_s1 + $0x18] sm:$0xff] }
   0xe   :  { %1745 = vmatpush.bf16.msra.mxu2 %v1690_v3  ;;  %166 = vmatpush.bf16.msra.mxu0 %v1690_v3  ;;  %v1698_v3 = vld [vmem:[%s2160_s2 + $0x60] sm:$0xff] }
  0x12   :  { %1746 = vmatpush.bf16.msra.mxu2 %v1689_v4  ;;  %167 = vmatpush.bf16.msra.mxu0 %v1689_v4  ;;  %v1888_v4 = vld [vmem:[%s2163_s1 + $0x30] sm:$0xff] }
  0x16   :  { %1747 = vmatpush.bf16.msra.mxu2 %v1688_v5  ;;  %168 = vmatpush.bf16.msra.mxu0 %v1688_v5  ;;  %v1895_v5 = vld [vmem:[%s2163_s1 + $0x38] sm:$0xff] }
  0x1a   :  { %1748 = vmatpush.bf16.msra.mxu2 %v1687_v6  ;;  %169 = vmatpush.bf16.msra.mxu0 %v1687_v6  ;;  %v1697_v6 = vld [vmem:[%s2160_s2 + $0x58] sm:$0xff] }
  0x1e   :  { %1749 = vmatpush.bf16.msra.mxu2 %v1686_v7  ;;  %170 = vmatpush.bf16.msra.mxu0 %v1686_v7  ;;  %v1696_v7 = vld [vmem:[%s2160_s2 + $0x50] sm:$0xff] }
  0x21   :  { %191 = vmatmul.bf16.vlgmr.msra.gmra.mxu2 %v1682_v8  ;;  %171 = vmatmul.bf16.vlgmr.msra.gmra.mxu0 %v1678_v9  ;;  %v1695_v8 = vld [vmem:[%s2160_s2 + $0x48] sm:$0xff]  ;;  %v1694_v9 = vld [vmem:[%s2160_s2 + $0x40] sm:$0xff] }
  0x22   :  { %407 = vmatpush.bf16.msrb.mxu2 %v1701_v63 }
  0x26   :  { %408 = vmatpush.bf16.msrb.mxu2 %v1700_v0 }
  0x2a   :  { %409 = vmatpush.bf16.msrb.mxu2 %v1699_v1 }
  0x2e   :  { %410 = vmatpush.bf16.msrb.mxu2 %v1698_v3 }
  0x31   :  { %196 = vmatmul.bf16.gmra.mxu2 %v1683_v10  ;;  %176 = vmatmul.bf16.gmra.mxu0 %v1679_v11  ;;  %v220_v11 = vperm.slane %v1835_v29, 1 }
  0x32   :  { %411 = vmatpush.bf16.msrb.mxu2 %v1697_v6 }
  0x36   :  { %412 = vmatpush.bf16.msrb.mxu2 %v1696_v7 }
  0x3a   :  { %413 = vmatpush.bf16.msrb.mxu2 %v1695_v8 }
  0x3e   :  { %414 = vmatpush.bf16.msrb.mxu2 %v1694_v9 }
  0x41   :  { %201 = vmatmul.bf16.gmra.mxu2 %v1684_v12  ;;  %181 = vmatmul.bf16.gmra.mxu0 %v1680_v13 }
  0x51   :  { %206 = vmatmul.bf16.gmra.mxu2 %v1685_v14  ;;  %186 = vmatmul.bf16.gmra.mxu0 %v1681_v15 }
  0x9e   :  { %v172_v16 = vpop.f32.mrf.mxu0 }
  0x9f   :  { %v173_v54 = vadd.f32 %v172_v16, %v66_v30 }
  0xa4   :  { %v192_v17 = vpop.f32.mrf.mxu2 }
  0xa5   :  { %v193_v44 = vadd.f32 %v192_v17, %v66_v30 }
  0xa6   :  { %v174_v19 = vpop.f32.mrf.mxu0 }
  0xa7   :  { %v175_v55 = vadd.f32 %v174_v19, %v66_v30 }
  0xa9   :  { %v212_v57 = vpack.c.bf16 %v175_v55, %v173_v54 }
  0xac   :  { %v194_v18 = vpop.f32.mrf.mxu2 }
  0xad   :  { %v195_v41 = vadd.f32 %v194_v18, %v66_v30 }
  0xae   :  { %v177_v21 = vpop.f32.mrf.mxu0 }
  0xaf   :  { %v216_v47 = vpack.c.bf16 %v195_v41, %v193_v44  ;;  %v178_v51 = vadd.f32 %v177_v21, %v66_v30 }
  0xb4   :  { %v197_v20 = vpop.f32.mrf.mxu2 }
  0xb5   :  { %v198_v40 = vadd.f32 %v197_v20, %v66_v30 }
  0xb6   :  { %v179_v23 = vpop.f32.mrf.mxu0 }
  0xb7   :  { %v180_v52 = vadd.f32 %v179_v23, %v66_v30 }
  0xb9   :  { %v213_v56 = vpack.c.bf16 %v180_v52, %v178_v51 }
  0xbc   :  { %v199_v22 = vpop.f32.mrf.mxu2 }
  0xbd   :  { %v200_v38 = vadd.f32 %v199_v22, %v66_v30 }
  0xbe   :  { %v182_v25 = vpop.f32.mrf.mxu0 }
  0xbf   :  { %v217_v42 = vpack.c.bf16 %v200_v38, %v198_v40  ;;  %v183_v48 = vadd.f32 %v182_v25, %v66_v30 }
  0xc4   :  { %v202_v24 = vpop.f32.mrf.mxu2 }
  0xc5   :  { %v203_v37 = vadd.f32 %v202_v24, %v66_v30 }
  0xc6   :  { %v184_v27 = vpop.f32.mrf.mxu0 }
  0xc7   :  { %v185_v49 = vadd.f32 %v184_v27, %v66_v30 }
  0xc9   :  { %v214_v53 = vpack.c.bf16 %v185_v49, %v183_v48 }
  0xcc   :  { %v204_v26 = vpop.f32.mrf.mxu2 }
  0xcd   :  { %v205_v35 = vadd.f32 %v204_v26, %v66_v30 }
  0xce   :  { %v187_v34 = vpop.f32.mrf.mxu0 }
  0xcf   :  { %v218_v39 = vpack.c.bf16 %v205_v35, %v203_v37  ;;  %v188_v45 = vadd.f32 %v187_v34, %v66_v30 }
  0xd4   :  { %v207_v28 = vpop.f32.mrf.mxu2 }
  0xd5   :  { %v208_v32 = vadd.f32 %v207_v28, %v66_v30 }
  0xd6   :  { %v189_v43 = vpop.f32.mrf.mxu0 }
  0xd7   :  { %v190_v46 = vadd.f32 %v189_v43, %v66_v30 }
  0xd9   :  { %v215_v50 = vpack.c.bf16 %v190_v46, %v188_v45 }
  0xdc   :  { %v209_v31 = vpop.f32.mrf.mxu2 }
  0xdd   :  { %v210_v33 = vadd.f32 %v209_v31, %v66_v30 }
  0xdf   :  { %v219_v36 = vpack.c.bf16 %v210_v33, %v208_v32 }
  0xe1   :  { %269 = vmatpush.bf16.msra.mxu1 %v219_v36  ;;  %1750 = vmatpush.bf16.msra.mxu3 %v219_v36 }
  0xe5   :  { %270 = vmatpush.bf16.msra.mxu1 %v218_v39  ;;  %1751 = vmatpush.bf16.msra.mxu3 %v218_v39 }
  0xe9   :  { %271 = vmatpush.bf16.msra.mxu1 %v217_v42  ;;  %1752 = vmatpush.bf16.msra.mxu3 %v217_v42 }
  0xed   :  { %272 = vmatpush.bf16.msra.mxu1 %v216_v47  ;;  %1753 = vmatpush.bf16.msra.mxu3 %v216_v47 }
  0xf1   :  { %273 = vmatpush.bf16.msra.mxu1 %v215_v50  ;;  %1754 = vmatpush.bf16.msra.mxu3 %v215_v50 }
  0xf5   :  { %274 = vmatpush.bf16.msra.mxu1 %v214_v53  ;;  %1755 = vmatpush.bf16.msra.mxu3 %v214_v53 }
  0xf9   :  { %275 = vmatpush.bf16.msra.mxu1 %v213_v56  ;;  %1756 = vmatpush.bf16.msra.mxu3 %v213_v56 }
  0xfd   :  { %276 = vmatpush.bf16.msra.mxu1 %v212_v57  ;;  %1757 = vmatpush.bf16.msra.mxu3 %v212_v57 }
 0x100   :  { %277 = vmatmul.bf16.vlgmr.msra.gmra.mxu1 %v1841_v58  ;;  %297 = vmatmul.bf16.vlgmr.msra.gmra.mxu3 %v1853_v60 }
 0x110   :  { %282 = vmatmul.bf16.gmra.mxu1 %v1847_v59  ;;  %302 = vmatmul.bf16.gmra.mxu3 %v1864_v62 }
 0x120   :  { %287 = vmatmul.bf16.gmra.mxu1 %v1859_v61  ;;  %307 = vmatmul.bf16.gmra.mxu3 %v1888_v4 }
 0x130   :  { %292 = vmatmul.bf16.gmra.mxu1 %v1880_v2  ;;  %312 = vmatmul.bf16.gmra.mxu3 %v1895_v5 }
 0x17d   :  { %v278_v10 = vpop.f32.mrf.mxu1 }
 0x17e   :  { %v279_v12 = vadd.f32 %v278_v10, %v220_v11 }
 0x180   :  { %v318_v15 = vmax.f32 %v279_v12, 0.0 }
 0x183   :  { %v298_v32 = vpop.f32.mrf.mxu3 }
 0x184   :  { %v299_v43 = vadd.f32 %v298_v32, %v220_v11 }
 0x185   :  { %v280_v13 = vpop.f32.mrf.mxu1 }
 0x186   :  { %v281_v14 = vadd.f32 %v280_v13, %v220_v11  ;;  %v326_v45 = vmax.f32 %v299_v43, 0.0  ;;  %v1703_v43 = vld [vmem:[%s2160_s2 + $0x88] sm:$0xff] }
 0x188   :  { %v319_v16 = vmax.f32 %v281_v14, 0.0 }
 0x18a   :  { %v334_v17 = vpack.c.bf16 %v319_v16, %v318_v15 }
 0x18b   :  { %v300_v35 = vpop.f32.mrf.mxu3 }
 0x18c   :  { %415 = vmatmul.bf16.vlgmr.msrb.gmra.mxu2 %v334_v17  ;;  %v301_v44 = vadd.f32 %v300_v35, %v220_v11 }
 0x18d   :  { %v283_v18 = vpop.f32.mrf.mxu1 }
 0x18e   :  { %v284_v19 = vadd.f32 %v283_v18, %v220_v11  ;;  %v327_v46 = vmax.f32 %v301_v44, 0.0  ;;  %v1702_v44 = vld [vmem:[%s2160_s2 + $0x80] sm:$0xff] }
 0x190   :  { %v320_v22 = vmax.f32 %v284_v19, 0.0  ;;  %v338_v48 = vpack.c.bf16 %v327_v46, %v326_v45  ;;  %v464_v46 = vperm.slane %v1835_v29, 2 }
 0x193   :  { %v303_v42 = vpop.f32.mrf.mxu3 }
 0x194   :  { %v304_v50 = vadd.f32 %v303_v42, %v220_v11  ;;  %v1704_v42 = vld [vmem:[%s2160_s2 + $0x90] sm:$0xff] }
 0x195   :  { %v285_v20 = vpop.f32.mrf.mxu1 }
 0x196   :  { %v286_v21 = vadd.f32 %v285_v20, %v220_v11  ;;  %v328_v52 = vmax.f32 %v304_v50, 0.0 }
 0x198   :  { %v321_v23 = vmax.f32 %v286_v21, 0.0 }
 0x19a   :  { %v335_v24 = vpack.c.bf16 %v321_v23, %v320_v22 }
 0x19b   :  { %v305_v47 = vpop.f32.mrf.mxu3 }
 0x19c   :  { %420 = vmatmul.bf16.gmra.mxu2 %v335_v24  ;;  %v306_v51 = vadd.f32 %v305_v47, %v220_v11 }
 0x19d   :  { %v288_v25 = vpop.f32.mrf.mxu1 }
 0x19e   :  { %v289_v26 = vadd.f32 %v288_v25, %v220_v11  ;;  %v329_v53 = vmax.f32 %v306_v51, 0.0 }
 0x1a0   :  { %v322_v30 = vmax.f32 %v289_v26, 0.0  ;;  %v339_v54 = vpack.c.bf16 %v329_v53, %v328_v52 }
 0x1a3   :  { %v308_v49 = vpop.f32.mrf.mxu3 }
 0x1a4   :  { %v309_v56 = vadd.f32 %v308_v49, %v220_v11 }
 0x1a5   :  { %v290_v27 = vpop.f32.mrf.mxu1 }
 0x1a6   :  { %v291_v28 = vadd.f32 %v290_v27, %v220_v11  ;;  %v330_v0 = vmax.f32 %v309_v56, 0.0 }
 0x1a8   :  { %v323_v31 = vmax.f32 %v291_v28, 0.0 }
 0x1aa   :  { %v336_v33 = vpack.c.bf16 %v323_v31, %v322_v30 }
 0x1ab   :  { %v310_v55 = vpop.f32.mrf.mxu3 }
 0x1ac   :  { %425 = vmatmul.bf16.gmra.mxu2 %v336_v33  ;;  %v311_v57 = vadd.f32 %v310_v55, %v220_v11 }
 0x1ad   :  { %v293_v34 = vpop.f32.mrf.mxu1 }
 0x1ae   :  { %v294_v36 = vadd.f32 %v293_v34, %v220_v11  ;;  %v331_v1 = vmax.f32 %v311_v57, 0.0 }
 0x1b0   :  { %v324_v39 = vmax.f32 %v294_v36, 0.0  ;;  %v340_v3 = vpack.c.bf16 %v331_v1, %v330_v0 }
 0x1b3   :  { %v313_v63 = vpop.f32.mrf.mxu3 }
 0x1b4   :  { %v314_v7 = vadd.f32 %v313_v63, %v220_v11 }
 0x1b5   :  { %v295_v37 = vpop.f32.mrf.mxu1 }
 0x1b6   :  { %v296_v38 = vadd.f32 %v295_v37, %v220_v11  ;;  %v332_v9 = vmax.f32 %v314_v7, 0.0  ;;  %v1709_v37 = vld [vmem:[%s2160_s2 + $0xb8] sm:$0xff] }
 0x1b7   :  { %603 = vmatpush.bf16.msrb.mxu0 %v1709_v37 }
 0x1b8   :  { %v325_v40 = vmax.f32 %v296_v38, 0.0  ;;  %v1708_v38 = vld [vmem:[%s2160_s2 + $0xb0] sm:$0xff] }
 0x1ba   :  { %v337_v41 = vpack.c.bf16 %v325_v40, %v324_v39  ;;  %v1707_v39 = vld [vmem:[%s2160_s2 + $0xa8] sm:$0xff]  ;;  %v1706_v40 = vld [vmem:[%s2160_s2 + $0xa0] sm:$0xff] }
 0x1bb   :  { %v315_v6 = vpop.f32.mrf.mxu3  ;;  %604 = vmatpush.bf16.msrb.mxu0 %v1708_v38 }
 0x1bc   :  { %430 = vmatmul.bf16.gmra.mxu2 %v337_v41  ;;  %v316_v8 = vadd.f32 %v315_v6, %v220_v11  ;;  %v1705_v41 = vld [vmem:[%s2160_s2 + $0x98] sm:$0xff] }
 0x1be   :  { %v333_v10 = vmax.f32 %v316_v8, 0.0 }
 0x1bf   :  { %605 = vmatpush.bf16.msrb.mxu0 %v1707_v39 }
 0x1c0   :  { %v341_v12 = vpack.c.bf16 %v333_v10, %v332_v9 }
 0x1c3   :  { %606 = vmatpush.bf16.msrb.mxu0 %v1706_v40 }
 0x1c7   :  { %607 = vmatpush.bf16.msrb.mxu0 %v1705_v41 }
 0x1cb   :  { %608 = vmatpush.bf16.msrb.mxu0 %v1704_v42 }
 0x1cc   :  { %435 = vmatmul.bf16.gmra.mxu2 %v338_v48 }
 0x1cf   :  { %609 = vmatpush.bf16.msrb.mxu0 %v1703_v43 }
 0x1d3   :  { %610 = vmatpush.bf16.msrb.mxu0 %v1702_v44 }
 0x1dc   :  { %440 = vmatmul.bf16.gmra.mxu2 %v339_v54 }
 0x1ec   :  { %445 = vmatmul.bf16.gmra.mxu2 %v340_v3 }
 0x1fc   :  { %450 = vmatmul.bf16.gmra.mxu2 %v341_v12 }
 0x20f   :  { %v416_v13 = vpop.f32.mrf.mxu2 }
 0x217   :  { %v418_v14 = vpop.f32.mrf.mxu2 }
 0x218   :  { %v456_v36 = vpack.c.bf16 %v418_v14, %v416_v13 }
 0x21f   :  { %v421_v15 = vpop.f32.mrf.mxu2 }
 0x227   :  { %v423_v16 = vpop.f32.mrf.mxu2 }
 0x228   :  { %v457_v35 = vpack.c.bf16 %v423_v16, %v421_v15 }
 0x22f   :  { %v426_v17 = vpop.f32.mrf.mxu2 }
 0x237   :  { %v428_v18 = vpop.f32.mrf.mxu2 }
 0x238   :  { %v458_v34 = vpack.c.bf16 %v428_v18, %v426_v17 }
 0x23f   :  { %v431_v19 = vpop.f32.mrf.mxu2 }
 0x247   :  { %v433_v20 = vpop.f32.mrf.mxu2 }
 0x248   :  { %v459_v33 = vpack.c.bf16 %v433_v20, %v431_v19 }
 0x24f   :  { %v436_v21 = vpop.f32.mrf.mxu2 }
 0x257   :  { %v438_v22 = vpop.f32.mrf.mxu2 }
 0x258   :  { %v460_v32 = vpack.c.bf16 %v438_v22, %v436_v21 }
 0x25f   :  { %v441_v23 = vpop.f32.mrf.mxu2 }
 0x267   :  { %v443_v24 = vpop.f32.mrf.mxu2 }
 0x268   :  { %v461_v31 = vpack.c.bf16 %v443_v24, %v441_v23 }
 0x26f   :  { %v446_v25 = vpop.f32.mrf.mxu2 }
 0x277   :  { %v448_v26 = vpop.f32.mrf.mxu2 }
 0x278   :  { %v462_v30 = vpack.c.bf16 %v448_v26, %v446_v25 }
 0x27f   :  { %v451_v27 = vpop.f32.mrf.mxu2 }
 0x287   :  { %v453_v11 = vpop.f32.mrf.mxu2 }
 0x288   :  { %v463_v28 = vpack.c.bf16 %v453_v11, %v451_v27 }
 0x28a   :  { %465 = vmatpush.bf16.msrb.mxu3 %v463_v28 }
 0x28e   :  { %466 = vmatpush.bf16.msrb.mxu3 %v462_v30 }
 0x292   :  { %467 = vmatpush.bf16.msrb.mxu3 %v461_v31 }
 0x296   :  { %468 = vmatpush.bf16.msrb.mxu3 %v460_v32 }
 0x29a   :  { %469 = vmatpush.bf16.msrb.mxu3 %v459_v33 }
 0x29e   :  { %470 = vmatpush.bf16.msrb.mxu3 %v458_v34 }
 0x2a2   :  { %471 = vmatpush.bf16.msrb.mxu3 %v457_v35 }
 0x2a6   :  { %472 = vmatpush.bf16.msrb.mxu3 %v456_v36 }
 0x2a9   :  { %473 = vmatmul.bf16.vlgmr.msrb.gmra.mxu3 %v1841_v58 }
 0x2b9   :  { %478 = vmatmul.bf16.gmra.mxu3 %v1847_v59 }
 0x2c9   :  { %483 = vmatmul.bf16.gmra.mxu3 %v1859_v61 }
 0x2d9   :  { %488 = vmatmul.bf16.gmra.mxu3 %v1880_v2 }
 0x2e9   :  { %493 = vmatmul.bf16.gmra.mxu3 %v1853_v60 }
 0x2f9   :  { %498 = vmatmul.bf16.gmra.mxu3 %v1864_v62 }
 0x309   :  { %503 = vmatmul.bf16.gmra.mxu3 %v1888_v4 }
 0x319   :  { %508 = vmatmul.bf16.gmra.mxu3 %v1895_v5 }
 0x32c   :  { %v474_v45 = vpop.f32.mrf.mxu3 }
 0x32d   :  { %v475_v47 = vadd.f32 %v474_v45, %v464_v46 }
 0x32f   :  { %v514_v50 = vmax.f32 %v475_v47, 0.0 }
 0x334   :  { %v476_v48 = vpop.f32.mrf.mxu3 }
 0x335   :  { %v477_v49 = vadd.f32 %v476_v48, %v464_v46 }
 0x337   :  { %v515_v51 = vmax.f32 %v477_v49, 0.0 }
 0x339   :  { %v530_v52 = vpack.c.bf16 %v515_v51, %v514_v50 }
 0x33b   :  { %611 = vmatmul.bf16.vlgmr.msrb.gmra.mxu0 %v530_v52 }
 0x33c   :  { %v479_v53 = vpop.f32.mrf.mxu3 }
 0x33d   :  { %v480_v54 = vadd.f32 %v479_v53, %v464_v46 }
 0x33f   :  { %v516_v57 = vmax.f32 %v480_v54, 0.0 }
 0x344   :  { %v481_v55 = vpop.f32.mrf.mxu3 }
 0x345   :  { %v482_v56 = vadd.f32 %v481_v55, %v464_v46 }
 0x347   :  { %v517_v63 = vmax.f32 %v482_v56, 0.0 }
 0x349   :  { %v531_v0 = vpack.c.bf16 %v517_v63, %v516_v57 }
 0x34b   :  { %616 = vmatmul.bf16.gmra.mxu0 %v531_v0 }
 0x34c   :  { %v484_v1 = vpop.f32.mrf.mxu3 }
 0x34d   :  { %v485_v3 = vadd.f32 %v484_v1, %v464_v46 }
 0x34f   :  { %v518_v8 = vmax.f32 %v485_v3, 0.0 }
 0x354   :  { %v486_v6 = vpop.f32.mrf.mxu3 }
 0x355   :  { %v487_v7 = vadd.f32 %v486_v6, %v464_v46 }
 0x357   :  { %v519_v9 = vmax.f32 %v487_v7, 0.0 }
 0x359   :  { %v532_v10 = vpack.c.bf16 %v519_v9, %v518_v8 }
 0x35b   :  { %621 = vmatmul.bf16.gmra.mxu0 %v532_v10 }
 0x35c   :  { %v489_v12 = vpop.f32.mrf.mxu3 }
 0x35d   :  { %v490_v13 = vadd.f32 %v489_v12, %v464_v46 }
 0x35f   :  { %v520_v16 = vmax.f32 %v490_v13, 0.0 }
 0x364   :  { %v491_v14 = vpop.f32.mrf.mxu3 }
 0x365   :  { %v492_v15 = vadd.f32 %v491_v14, %v464_v46 }
 0x367   :  { %v521_v17 = vmax.f32 %v492_v15, 0.0 }
 0x369   :  { %v533_v18 = vpack.c.bf16 %v521_v17, %v520_v16  ;;  %v1717_v16 = vld [vmem:[%s2160_s2 + $0xf8] sm:$0xff]  ;;  %v1716_v17 = vld [vmem:[%s2160_s2 + $0xf0] sm:$0xff] }
 0x36a   :  { %800 = vmatpush.bf16.msra.mxu2 %v1717_v16 }
 0x36b   :  { %626 = vmatmul.bf16.gmra.mxu0 %v533_v18  ;;  %v1715_v18 = vld [vmem:[%s2160_s2 + $0xe8] sm:$0xff] }
 0x36c   :  { %v494_v19 = vpop.f32.mrf.mxu3 }
 0x36d   :  { %v495_v20 = vadd.f32 %v494_v19, %v464_v46  ;;  %v1977_v19 = vperm.slane %v1835_v29, 3 }
 0x36e   :  { %801 = vmatpush.bf16.msra.mxu2 %v1716_v17  ;;  %v1720_v17 = vld [vmem:[%s2160_s2 + $0x110] sm:$0xff] }
 0x36f   :  { %v522_v23 = vmax.f32 %v495_v20, 0.0 }
 0x372   :  { %802 = vmatpush.bf16.msra.mxu2 %v1715_v18 }
 0x374   :  { %v496_v21 = vpop.f32.mrf.mxu3 }
 0x375   :  { %v497_v22 = vadd.f32 %v496_v21, %v464_v46 }
 0x377   :  { %v523_v24 = vmax.f32 %v497_v22, 0.0 }
 0x379   :  { %v534_v25 = vpack.c.bf16 %v523_v24, %v522_v23 }
 0x37b   :  { %631 = vmatmul.bf16.gmra.mxu0 %v534_v25 }
 0x37c   :  { %v499_v26 = vpop.f32.mrf.mxu3 }
 0x37d   :  { %v500_v27 = vadd.f32 %v499_v26, %v464_v46 }
 0x37f   :  { %v524_v30 = vmax.f32 %v500_v27, 0.0 }
 0x384   :  { %v501_v11 = vpop.f32.mrf.mxu3 }
 0x385   :  { %v502_v28 = vadd.f32 %v501_v11, %v464_v46 }
 0x387   :  { %v525_v31 = vmax.f32 %v502_v28, 0.0 }
 0x389   :  { %v535_v32 = vpack.c.bf16 %v525_v31, %v524_v30 }
 0x38b   :  { %636 = vmatmul.bf16.gmra.mxu0 %v535_v32  ;;  %v1725_v32 = vld [vmem:[%s2160_s2 + $0x138] sm:$0xff] }
 0x38c   :  { %v504_v33 = vpop.f32.mrf.mxu3  ;;  %939 = vmatpush.bf16.msra.mxu3 %v1725_v32 }
 0x38d   :  { %v505_v34 = vadd.f32 %v504_v33, %v464_v46 }
 0x38f   :  { %v526_v37 = vmax.f32 %v505_v34, 0.0 }
 0x394   :  { %v506_v35 = vpop.f32.mrf.mxu3 }
 0x395   :  { %v507_v36 = vadd.f32 %v506_v35, %v464_v46 }
 0x397   :  { %v527_v38 = vmax.f32 %v507_v36, 0.0 }
 0x399   :  { %v536_v39 = vpack.c.bf16 %v527_v38, %v526_v37 }
 0x39b   :  { %641 = vmatmul.bf16.gmra.mxu0 %v536_v39 }
 0x39c   :  { %v509_v40 = vpop.f32.mrf.mxu3 }
 0x39d   :  { %v510_v41 = vadd.f32 %v509_v40, %v464_v46  ;;  %v1724_v40 = vld [vmem:[%s2160_s2 + $0x130] sm:$0xff] }
 0x39e   :  { %940 = vmatpush.bf16.msra.mxu3 %v1724_v40 }
 0x39f   :  { %v528_v44 = vmax.f32 %v510_v41, 0.0 }
 0x3a4   :  { %v511_v42 = vpop.f32.mrf.mxu3 }
 0x3a5   :  { %v512_v43 = vadd.f32 %v511_v42, %v464_v46 }
 0x3a7   :  { %v529_v45 = vmax.f32 %v512_v43, 0.0 }
 0x3a9   :  { %v537_v47 = vpack.c.bf16 %v529_v45, %v528_v44 }
 0x3ab   :  { %646 = vmatmul.bf16.gmra.mxu0 %v537_v47 }
 0x3b8   :  { %v612_v48 = vpop.f32.mrf.mxu0 }
 0x3c0   :  { %v614_v49 = vpop.f32.mrf.mxu0 }
 0x3c1   :  { %v652_v15 = vpack.c.bf16 %v614_v49, %v612_v48  ;;  %v1723_v49 = vld [vmem:[%s2160_s2 + $0x128] sm:$0xff] }
 0x3c2   :  { %941 = vmatpush.bf16.msra.mxu3 %v1723_v49 }
 0x3c8   :  { %v617_v50 = vpop.f32.mrf.mxu0 }
 0x3d0   :  { %v619_v51 = vpop.f32.mrf.mxu0 }
 0x3d1   :  { %v653_v14 = vpack.c.bf16 %v619_v51, %v617_v50 }
 0x3d8   :  { %v622_v52 = vpop.f32.mrf.mxu0 }
 0x3e0   :  { %v624_v53 = vpop.f32.mrf.mxu0 }
 0x3e1   :  { %v654_v13 = vpack.c.bf16 %v624_v53, %v622_v52 }
 0x3e8   :  { %v627_v54 = vpop.f32.mrf.mxu0 }
 0x3f0   :  { %v629_v55 = vpop.f32.mrf.mxu0 }
 0x3f1   :  { %v655_v12 = vpack.c.bf16 %v629_v55, %v627_v54 }
 0x3f8   :  { %v632_v56 = vpop.f32.mrf.mxu0 }
 0x400   :  { %v634_v57 = vpop.f32.mrf.mxu0 }
 0x401   :  { %v656_v10 = vpack.c.bf16 %v634_v57, %v632_v56  ;;  %v1722_v57 = vld [vmem:[%s2160_s2 + $0x120] sm:$0xff] }
 0x402   :  { %942 = vmatpush.bf16.msra.mxu3 %v1722_v57 }
 0x408   :  { %v637_v63 = vpop.f32.mrf.mxu0 }
 0x410   :  { %v639_v0 = vpop.f32.mrf.mxu0 }
 0x411   :  { %v657_v9 = vpack.c.bf16 %v639_v0, %v637_v63 }
 0x418   :  { %v642_v1 = vpop.f32.mrf.mxu0 }
 0x420   :  { %v644_v3 = vpop.f32.mrf.mxu0 }
 0x421   :  { %v658_v8 = vpack.c.bf16 %v644_v3, %v642_v1 }
 0x428   :  { %v647_v6 = vpop.f32.mrf.mxu0 }
 0x430   :  { %v649_v46 = vpop.f32.mrf.mxu0 }
 0x431   :  { %v659_v7 = vpack.c.bf16 %v649_v46, %v647_v6 }
 0x433   :  { %661 = vmatpush.bf16.msrb.mxu1 %v659_v7  ;;  %v1721_v7 = vld [vmem:[%s2160_s2 + $0x118] sm:$0xff] }
 0x434   :  { %943 = vmatpush.bf16.msra.mxu3 %v1721_v7 }
 0x437   :  { %662 = vmatpush.bf16.msrb.mxu1 %v658_v8 }
 0x438   :  { %944 = vmatpush.bf16.msra.mxu3 %v1720_v17 }
 0x43b   :  { %663 = vmatpush.bf16.msrb.mxu1 %v657_v9 }
 0x43f   :  { %664 = vmatpush.bf16.msrb.mxu1 %v656_v10 }
 0x443   :  { %665 = vmatpush.bf16.msrb.mxu1 %v655_v12 }
 0x447   :  { %666 = vmatpush.bf16.msrb.mxu1 %v654_v13 }
 0x44b   :  { %667 = vmatpush.bf16.msrb.mxu1 %v653_v14 }
 0x44f   :  { %668 = vmatpush.bf16.msrb.mxu1 %v652_v15 }
 0x452   :  { %669 = vmatmul.bf16.vlgmr.msrb.gmra.mxu1 %v1841_v58  ;;  %v1714_v58 = vld [vmem:[%s2160_s2 + $0xe0] sm:$0xff] }
 0x453   :  { %803 = vmatpush.bf16.msra.mxu2 %v1714_v58 }
 0x462   :  { %674 = vmatmul.bf16.gmra.mxu1 %v1847_v59  ;;  %v1713_v59 = vld [vmem:[%s2160_s2 + $0xd8] sm:$0xff] }
 0x463   :  { %804 = vmatpush.bf16.msra.mxu2 %v1713_v59  ;;  %v1719_v59 = vld [vmem:[%s2160_s2 + $0x108] sm:$0xff] }
 0x464   :  { %945 = vmatpush.bf16.msra.mxu3 %v1719_v59 }
 0x472   :  { %679 = vmatmul.bf16.gmra.mxu1 %v1859_v61  ;;  %v1712_v61 = vld [vmem:[%s2160_s2 + $0xd0] sm:$0xff] }
 0x473   :  { %805 = vmatpush.bf16.msra.mxu2 %v1712_v61 }
 0x482   :  { %684 = vmatmul.bf16.gmra.mxu1 %v1880_v2  ;;  %v1711_v2 = vld [vmem:[%s2160_s2 + $0xc8] sm:$0xff] }
 0x483   :  { %806 = vmatpush.bf16.msra.mxu2 %v1711_v2 }
 0x492   :  { %689 = vmatmul.bf16.gmra.mxu1 %v1853_v60  ;;  %v1710_v60 = vld [vmem:[%s2160_s2 + $0xc0] sm:$0xff] }
 0x493   :  { %807 = vmatpush.bf16.msra.mxu2 %v1710_v60 }
 0x4a2   :  { %694 = vmatmul.bf16.gmra.mxu1 %v1864_v62 }
 0x4b2   :  { %699 = vmatmul.bf16.gmra.mxu1 %v1888_v4 }
 0x4c2   :  { %704 = vmatmul.bf16.gmra.mxu1 %v1895_v5 }
 0x4cf   :  { %v670_v62 = vpop.f32.mrf.mxu1 }
 0x4d0   :  { %v671_v20 = vadd.f32 %v670_v62, %v1977_v19  ;;  %v1718_v62 = vld [vmem:[%s2160_s2 + $0x100] sm:$0xff] }
 0x4d1   :  { %946 = vmatpush.bf16.msra.mxu3 %v1718_v62 }
 0x4d2   :  { %v710_v22 = vmax.f32 %v671_v20, 0.0 }
 0x4d7   :  { %v672_v4 = vpop.f32.mrf.mxu1 }
 0x4d8   :  { %v673_v21 = vadd.f32 %v672_v4, %v1977_v19 }
 0x4da   :  { %v711_v23 = vmax.f32 %v673_v21, 0.0  ;;  %v2020_v21 = vperm.slane %v1835_v29, 4 }
 0x4dc   :  { %v726_v24 = vpack.c.bf16 %v711_v23, %v710_v22 }
 0x4de   :  { %808 = vmatmul.bf16.vlgmr.msra.gmra.mxu2 %v726_v24 }
 0x4df   :  { %v675_v25 = vpop.f32.mrf.mxu1 }
 0x4e0   :  { %v676_v26 = vadd.f32 %v675_v25, %v1977_v19 }
 0x4e2   :  { %v712_v5 = vmax.f32 %v676_v26, 0.0 }
 0x4e7   :  { %v677_v27 = vpop.f32.mrf.mxu1 }
 0x4e8   :  { %v678_v11 = vadd.f32 %v677_v27, %v1977_v19 }
 0x4ea   :  { %v713_v28 = vmax.f32 %v678_v11, 0.0 }
 0x4ec   :  { %v727_v30 = vpack.c.bf16 %v713_v28, %v712_v5 }
 0x4ee   :  { %813 = vmatmul.bf16.gmra.mxu2 %v727_v30 }
 0x4ef   :  { %v680_v31 = vpop.f32.mrf.mxu1 }
 0x4f0   :  { %v681_v33 = vadd.f32 %v680_v31, %v1977_v19 }
 0x4f2   :  { %v714_v36 = vmax.f32 %v681_v33, 0.0 }
 0x4f7   :  { %v682_v34 = vpop.f32.mrf.mxu1 }
 0x4f8   :  { %v683_v35 = vadd.f32 %v682_v34, %v1977_v19  ;;  %v1733_v34 = vld [vmem:[%s2160_s2 + $0x178] sm:$0xff] }
 0x4f9   :  { %1078 = vmatpush.bf16.msra.mxu0 %v1733_v34 }
 0x4fa   :  { %v715_v37 = vmax.f32 %v683_v35, 0.0 }
 0x4fc   :  { %v728_v38 = vpack.c.bf16 %v715_v37, %v714_v36 }
 0x4fe   :  { %818 = vmatmul.bf16.gmra.mxu2 %v728_v38 }
 0x4ff   :  { %v685_v39 = vpop.f32.mrf.mxu1 }
 0x500   :  { %v686_v41 = vadd.f32 %v685_v39, %v1977_v19 }
 0x502   :  { %v716_v44 = vmax.f32 %v686_v41, 0.0 }
 0x507   :  { %v687_v42 = vpop.f32.mrf.mxu1 }
 0x508   :  { %v688_v43 = vadd.f32 %v687_v42, %v1977_v19  ;;  %v1732_v42 = vld [vmem:[%s2160_s2 + $0x170] sm:$0xff] }
 0x509   :  { %1079 = vmatpush.bf16.msra.mxu0 %v1732_v42  ;;  %v1740_v42 = vld [vmem:[%s2160_s2 + $0x1b0] sm:$0xff] }
 0x50a   :  { %v717_v45 = vmax.f32 %v688_v43, 0.0 }
 0x50c   :  { %v729_v47 = vpack.c.bf16 %v717_v45, %v716_v44 }
 0x50e   :  { %823 = vmatmul.bf16.gmra.mxu2 %v729_v47 }
 0x50f   :  { %v690_v48 = vpop.f32.mrf.mxu1 }
 0x510   :  { %v691_v50 = vadd.f32 %v690_v48, %v1977_v19 }
 0x512   :  { %v718_v53 = vmax.f32 %v691_v50, 0.0 }
 0x517   :  { %v692_v51 = vpop.f32.mrf.mxu1 }
 0x518   :  { %v693_v52 = vadd.f32 %v692_v51, %v1977_v19  ;;  %v1731_v51 = vld [vmem:[%s2160_s2 + $0x168] sm:$0xff] }
 0x519   :  { %1080 = vmatpush.bf16.msra.mxu0 %v1731_v51  ;;  %v1739_v51 = vld [vmem:[%s2160_s2 + $0x1a8] sm:$0xff] }
 0x51a   :  { %v719_v54 = vmax.f32 %v693_v52, 0.0 }
 0x51c   :  { %v730_v55 = vpack.c.bf16 %v719_v54, %v718_v53 }
 0x51e   :  { %828 = vmatmul.bf16.gmra.mxu2 %v730_v55 }
 0x51f   :  { %v695_v56 = vpop.f32.mrf.mxu1 }
 0x520   :  { %v696_v63 = vadd.f32 %v695_v56, %v1977_v19 }
 0x522   :  { %v720_v3 = vmax.f32 %v696_v63, 0.0 }
 0x527   :  { %v697_v0 = vpop.f32.mrf.mxu1 }
 0x528   :  { %v698_v1 = vadd.f32 %v697_v0, %v1977_v19  ;;  %v1730_v0 = vld [vmem:[%s2160_s2 + $0x160] sm:$0xff] }
 0x529   :  { %1081 = vmatpush.bf16.msra.mxu0 %v1730_v0  ;;  %v1738_v0 = vld [vmem:[%s2160_s2 + $0x1a0] sm:$0xff] }
 0x52a   :  { %v721_v6 = vmax.f32 %v698_v1, 0.0 }
 0x52c   :  { %v731_v46 = vpack.c.bf16 %v721_v6, %v720_v3 }
 0x52e   :  { %833 = vmatmul.bf16.gmra.mxu2 %v731_v46 }
 0x52f   :  { %v700_v8 = vpop.f32.mrf.mxu1 }
 0x530   :  { %v701_v9 = vadd.f32 %v700_v8, %v1977_v19 }
 0x532   :  { %v722_v13 = vmax.f32 %v701_v9, 0.0  ;;  %v1729_v9 = vld [vmem:[%s2160_s2 + $0x158] sm:$0xff] }
 0x533   :  { %1082 = vmatpush.bf16.msra.mxu0 %v1729_v9 }
 0x537   :  { %v702_v10 = vpop.f32.mrf.mxu1 }
 0x538   :  { %v703_v12 = vadd.f32 %v702_v10, %v1977_v19 }
 0x53a   :  { %v723_v14 = vmax.f32 %v703_v12, 0.0 }
 0x53c   :  { %v732_v15 = vpack.c.bf16 %v723_v14, %v722_v13 }
 0x53e   :  { %838 = vmatmul.bf16.gmra.mxu2 %v732_v15 }
 0x53f   :  { %v705_v16 = vpop.f32.mrf.mxu1 }
 0x540   :  { %v706_v18 = vadd.f32 %v705_v16, %v1977_v19 }
 0x542   :  { %v724_v2 = vmax.f32 %v706_v18, 0.0 }
 0x547   :  { %v707_v58 = vpop.f32.mrf.mxu1 }
 0x548   :  { %v708_v61 = vadd.f32 %v707_v58, %v1977_v19  ;;  %v1728_v58 = vld [vmem:[%s2160_s2 + $0x150] sm:$0xff] }
 0x549   :  { %1083 = vmatpush.bf16.msra.mxu0 %v1728_v58  ;;  %v1736_v58 = vld [vmem:[%s2160_s2 + $0x190] sm:$0xff] }
 0x54a   :  { %v725_v60 = vmax.f32 %v708_v61, 0.0 }
 0x54c   :  { %v733_v20 = vpack.c.bf16 %v725_v60, %v724_v2  ;;  %v1727_v2 = vld [vmem:[%s2160_s2 + $0x148] sm:$0xff] }
 0x54d   :  { %1084 = vmatpush.bf16.msra.mxu0 %v1727_v2  ;;  %v1734_v2 = vld [vmem:[%s2160_s2 + $0x180] sm:$0xff] }
 0x54e   :  { %843 = vmatmul.bf16.gmra.mxu2 %v733_v20 }
 0x561   :  { %v809_v4 = vpop.f32.mrf.mxu2 }
 0x562   :  { %v810_v22 = vadd.f32 %v809_v4, %v2020_v21  ;;  %v1726_v4 = vld [vmem:[%s2160_s2 + $0x140] sm:$0xff] }
 0x563   :  { %1085 = vmatpush.bf16.msra.mxu0 %v1726_v4 }
 0x564   :  { %v849_v19 = vmax.f32 %v810_v22, 0.0 }
 0x569   :  { %v811_v23 = vpop.f32.mrf.mxu2 }
 0x56a   :  { %v812_v24 = vadd.f32 %v811_v23, %v2020_v21 }
 0x56c   :  { %v850_v25 = vmax.f32 %v812_v24, 0.0  ;;  %v2063_v24 = vperm.slane %v1835_v29, 5  ;;  %v1741_v29 = vld [vmem:[%s2160_s2 + $0x1b8] sm:$0xff] }
 0x56d   :  { %1217 = vmatpush.bf16.msra.mxu1 %v1741_v29 }
 0x56e   :  { %v865_v26 = vpack.c.bf16 %v850_v25, %v849_v19 }
 0x570   :  { %947 = vmatmul.bf16.vlgmr.msra.gmra.mxu3 %v865_v26 }
 0x571   :  { %v814_v27 = vpop.f32.mrf.mxu2  ;;  %1218 = vmatpush.bf16.msra.mxu1 %v1740_v42 }
 0x572   :  { %v815_v11 = vadd.f32 %v814_v27, %v2020_v21 }
 0x574   :  { %v851_v30 = vmax.f32 %v815_v11, 0.0 }
 0x575   :  { %1219 = vmatpush.bf16.msra.mxu1 %v1739_v51 }
 0x579   :  { %v816_v5 = vpop.f32.mrf.mxu2  ;;  %1220 = vmatpush.bf16.msra.mxu1 %v1738_v0 }
 0x57a   :  { %v817_v28 = vadd.f32 %v816_v5, %v2020_v21 }
 0x57c   :  { %v852_v31 = vmax.f32 %v817_v28, 0.0 }
 0x57e   :  { %v866_v32 = vpack.c.bf16 %v852_v31, %v851_v30 }
 0x580   :  { %952 = vmatmul.bf16.gmra.mxu3 %v866_v32 }
 0x581   :  { %v819_v33 = vpop.f32.mrf.mxu2 }
 0x582   :  { %v820_v35 = vadd.f32 %v819_v33, %v2020_v21 }
 0x584   :  { %v853_v38 = vmax.f32 %v820_v35, 0.0 }
 0x589   :  { %v821_v36 = vpop.f32.mrf.mxu2 }
 0x58a   :  { %v822_v37 = vadd.f32 %v821_v36, %v2020_v21 }
 0x58c   :  { %v854_v39 = vmax.f32 %v822_v37, 0.0 }
 0x58e   :  { %v867_v40 = vpack.c.bf16 %v854_v39, %v853_v38 }
 0x590   :  { %957 = vmatmul.bf16.gmra.mxu3 %v867_v40 }
 0x591   :  { %v824_v41 = vpop.f32.mrf.mxu2 }
 0x592   :  { %v825_v43 = vadd.f32 %v824_v41, %v2020_v21 }
 0x594   :  { %v855_v47 = vmax.f32 %v825_v43, 0.0 }
 0x599   :  { %v826_v44 = vpop.f32.mrf.mxu2 }
 0x59a   :  { %v827_v45 = vadd.f32 %v826_v44, %v2020_v21 }
 0x59c   :  { %v856_v48 = vmax.f32 %v827_v45, 0.0 }
 0x59e   :  { %v868_v49 = vpack.c.bf16 %v856_v48, %v855_v47 }
 0x5a0   :  { %962 = vmatmul.bf16.gmra.mxu3 %v868_v49 }
 0x5a1   :  { %v829_v50 = vpop.f32.mrf.mxu2 }
 0x5a2   :  { %v830_v52 = vadd.f32 %v829_v50, %v2020_v21 }
 0x5a4   :  { %v857_v55 = vmax.f32 %v830_v52, 0.0 }
 0x5a9   :  { %v831_v53 = vpop.f32.mrf.mxu2 }
 0x5aa   :  { %v832_v54 = vadd.f32 %v831_v53, %v2020_v21 }
 0x5ac   :  { %v858_v56 = vmax.f32 %v832_v54, 0.0 }
 0x5ae   :  { %v869_v57 = vpack.c.bf16 %v858_v56, %v857_v55 }
 0x5b0   :  { %967 = vmatmul.bf16.gmra.mxu3 %v869_v57 }
 0x5b1   :  { %v834_v63 = vpop.f32.mrf.mxu2 }
 0x5b2   :  { %v835_v1 = vadd.f32 %v834_v63, %v2020_v21 }
 0x5b4   :  { %v859_v46 = vmax.f32 %v835_v1, 0.0 }
 0x5b9   :  { %v836_v3 = vpop.f32.mrf.mxu2 }
 0x5ba   :  { %v837_v6 = vadd.f32 %v836_v3, %v2020_v21 }
 0x5bc   :  { %v860_v7 = vmax.f32 %v837_v6, 0.0 }
 0x5be   :  { %v870_v8 = vpack.c.bf16 %v860_v7, %v859_v46 }
 0x5c0   :  { %972 = vmatmul.bf16.gmra.mxu3 %v870_v8 }
 0x5c1   :  { %v839_v10 = vpop.f32.mrf.mxu2 }
 0x5c2   :  { %v840_v12 = vadd.f32 %v839_v10, %v2020_v21  ;;  %v1737_v10 = vld [vmem:[%s2160_s2 + $0x198] sm:$0xff] }
 0x5c3   :  { %1221 = vmatpush.bf16.msra.mxu1 %v1737_v10 }
 0x5c4   :  { %v861_v15 = vmax.f32 %v840_v12, 0.0 }
 0x5c7   :  { %1222 = vmatpush.bf16.msra.mxu1 %v1736_v58 }
 0x5c9   :  { %v841_v13 = vpop.f32.mrf.mxu2 }
 0x5ca   :  { %v842_v14 = vadd.f32 %v841_v13, %v2020_v21 }
 0x5cc   :  { %v862_v16 = vmax.f32 %v842_v14, 0.0 }
 0x5ce   :  { %v871_v17 = vpack.c.bf16 %v862_v16, %v861_v15 }
 0x5d0   :  { %977 = vmatmul.bf16.gmra.mxu3 %v871_v17 }
 0x5d1   :  { %v844_v18 = vpop.f32.mrf.mxu2 }
 0x5d2   :  { %v845_v59 = vadd.f32 %v844_v18, %v2020_v21 }
 0x5d4   :  { %v863_v62 = vmax.f32 %v845_v59, 0.0 }
 0x5d9   :  { %v846_v61 = vpop.f32.mrf.mxu2 }
 0x5da   :  { %v847_v60 = vadd.f32 %v846_v61, %v2020_v21  ;;  %v1735_v61 = vld [vmem:[%s2160_s2 + $0x188] sm:$0xff] }
 0x5db   :  { %1223 = vmatpush.bf16.msra.mxu1 %v1735_v61 }
 0x5dc   :  { %v864_v20 = vmax.f32 %v847_v60, 0.0 }
 0x5de   :  { %v872_v22 = vpack.c.bf16 %v864_v20, %v863_v62 }
 0x5df   :  { %1224 = vmatpush.bf16.msra.mxu1 %v1734_v2 }
 0x5e0   :  { %982 = vmatmul.bf16.gmra.mxu3 %v872_v22 }
 0x5f3   :  { %v948_v23 = vpop.f32.mrf.mxu3 }
 0x5f4   :  { %v949_v19 = vadd.f32 %v948_v23, %v2063_v24 }
 0x5f6   :  { %v988_v21 = vmax.f32 %v949_v19, 0.0 }
 0x5fb   :  { %v950_v25 = vpop.f32.mrf.mxu3 }
 0x5fc   :  { %v951_v26 = vadd.f32 %v950_v25, %v2063_v24  ;;  %v2108_v25 = vld [vmem:[%s2162_s3] sm:$0xff] }
 0x5fe   :  { %v989_v27 = vmax.f32 %v951_v26, 0.0  ;;  %v1029_v26 = vperm.slane %v2108_v25, 6 }
 0x600   :  { %v1004_v11 = vpack.c.bf16 %v989_v27, %v988_v21 }
 0x602   :  { %1086 = vmatmul.bf16.vlgmr.msra.gmra.mxu0 %v1004_v11 }
 0x603   :  { %v953_v5 = vpop.f32.mrf.mxu3 }
 0x604   :  { %v954_v28 = vadd.f32 %v953_v5, %v2063_v24 }
 0x606   :  { %v990_v32 = vmax.f32 %v954_v28, 0.0 }
 0x60b   :  { %v955_v30 = vpop.f32.mrf.mxu3 }
 0x60c   :  { %v956_v31 = vadd.f32 %v955_v30, %v2063_v24 }
 0x60e   :  { %v991_v33 = vmax.f32 %v956_v31, 0.0 }
 0x610   :  { %v1005_v34 = vpack.c.bf16 %v991_v33, %v990_v32 }
 0x612   :  { %1091 = vmatmul.bf16.gmra.mxu0 %v1005_v34 }
 0x613   :  { %v958_v35 = vpop.f32.mrf.mxu3 }
 0x614   :  { %v959_v36 = vadd.f32 %v958_v35, %v2063_v24 }
 0x616   :  { %v992_v39 = vmax.f32 %v959_v36, 0.0 }
 0x61b   :  { %v960_v37 = vpop.f32.mrf.mxu3 }
 0x61c   :  { %v961_v38 = vadd.f32 %v960_v37, %v2063_v24 }
 0x61e   :  { %v993_v40 = vmax.f32 %v961_v38, 0.0 }
 0x620   :  { %v1006_v41 = vpack.c.bf16 %v993_v40, %v992_v39 }
 0x622   :  { %1096 = vmatmul.bf16.gmra.mxu0 %v1006_v41 }
 0x623   :  { %v963_v43 = vpop.f32.mrf.mxu3 }
 0x624   :  { %v964_v44 = vadd.f32 %v963_v43, %v2063_v24 }
 0x626   :  { %v994_v48 = vmax.f32 %v964_v44, 0.0 }
 0x62b   :  { %v965_v45 = vpop.f32.mrf.mxu3 }
 0x62c   :  { %v966_v47 = vadd.f32 %v965_v45, %v2063_v24 }
 0x62e   :  { %v995_v49 = vmax.f32 %v966_v47, 0.0 }
 0x630   :  { %v1007_v50 = vpack.c.bf16 %v995_v49, %v994_v48 }
 0x632   :  { %1101 = vmatmul.bf16.gmra.mxu0 %v1007_v50 }
 0x633   :  { %v968_v52 = vpop.f32.mrf.mxu3 }
 0x634   :  { %v969_v53 = vadd.f32 %v968_v52, %v2063_v24 }
 0x636   :  { %v996_v56 = vmax.f32 %v969_v53, 0.0 }
 0x63b   :  { %v970_v54 = vpop.f32.mrf.mxu3 }
 0x63c   :  { %v971_v55 = vadd.f32 %v970_v54, %v2063_v24 }
 0x63e   :  { %v997_v57 = vmax.f32 %v971_v55, 0.0 }
 0x640   :  { %v1008_v63 = vpack.c.bf16 %v997_v57, %v996_v56 }
 0x642   :  { %1106 = vmatmul.bf16.gmra.mxu0 %v1008_v63 }
 0x643   :  { %v973_v1 = vpop.f32.mrf.mxu3 }
 0x644   :  { %v974_v3 = vadd.f32 %v973_v1, %v2063_v24 }
 0x646   :  { %v998_v7 = vmax.f32 %v974_v3, 0.0 }
 0x64b   :  { %v975_v6 = vpop.f32.mrf.mxu3 }
 0x64c   :  { %v976_v46 = vadd.f32 %v975_v6, %v2063_v24 }
 0x64e   :  { %v999_v8 = vmax.f32 %v976_v46, 0.0 }
 0x650   :  { %v1009_v9 = vpack.c.bf16 %v999_v8, %v998_v7 }
 0x652   :  { %1111 = vmatmul.bf16.gmra.mxu0 %v1009_v9 }
 0x653   :  { %v978_v12 = vpop.f32.mrf.mxu3 }
 0x654   :  { %v979_v13 = vadd.f32 %v978_v12, %v2063_v24 }
 0x656   :  { %v1000_v16 = vmax.f32 %v979_v13, 0.0 }
 0x65b   :  { %v980_v14 = vpop.f32.mrf.mxu3 }
 0x65c   :  { %v981_v15 = vadd.f32 %v980_v14, %v2063_v24 }
 0x65e   :  { %v1001_v17 = vmax.f32 %v981_v15, 0.0 }
 0x660   :  { %v1010_v18 = vpack.c.bf16 %v1001_v17, %v1000_v16 }
 0x662   :  { %1116 = vmatmul.bf16.gmra.mxu0 %v1010_v18 }
 0x663   :  { %v983_v59 = vpop.f32.mrf.mxu3 }
 0x664   :  { %v984_v60 = vadd.f32 %v983_v59, %v2063_v24 }
 0x666   :  { %v1002_v4 = vmax.f32 %v984_v60, 0.0  ;;  %v1168_v60 = vperm.slane %v2108_v25, 7 }
 0x66b   :  { %v985_v62 = vpop.f32.mrf.mxu3 }
 0x66c   :  { %v986_v20 = vadd.f32 %v985_v62, %v2063_v24 }
 0x66e   :  { %v1003_v22 = vmax.f32 %v986_v20, 0.0 }
 0x670   :  { %v1011_v23 = vpack.c.bf16 %v1003_v22, %v1002_v4 }
 0x672   :  { %1121 = vmatmul.bf16.gmra.mxu0 %v1011_v23 }
 0x67f   :  { %v1087_v19 = vpop.f32.mrf.mxu0 }
 0x680   :  { %v1088_v21 = vadd.f32 %v1087_v19, %v1029_v26 }
 0x682   :  { %v1127_v5 = vmax.f32 %v1088_v21, 0.0 }
 0x687   :  { %v1089_v27 = vpop.f32.mrf.mxu0 }
 0x688   :  { %v1090_v11 = vadd.f32 %v1089_v27, %v1029_v26 }
 0x68a   :  { %v1128_v28 = vmax.f32 %v1090_v11, 0.0 }
 0x68c   :  { %v1143_v30 = vpack.c.bf16 %v1128_v28, %v1127_v5 }
 0x68e   :  { %1225 = vmatmul.bf16.vlgmr.msra.gmra.mxu1 %v1143_v30 }
 0x68f   :  { %v1092_v24 = vpop.f32.mrf.mxu0 }
 0x690   :  { %v1093_v31 = vadd.f32 %v1092_v24, %v1029_v26 }
 0x692   :  { %v1129_v34 = vmax.f32 %v1093_v31, 0.0 }
 0x697   :  { %v1094_v32 = vpop.f32.mrf.mxu0 }
 0x698   :  { %v1095_v33 = vadd.f32 %v1094_v32, %v1029_v26 }
 0x69a   :  { %v1130_v29 = vmax.f32 %v1095_v33, 0.0 }
 0x69c   :  { %v1144_v35 = vpack.c.bf16 %v1130_v29, %v1129_v34 }
 0x69e   :  { %1230 = vmatmul.bf16.gmra.mxu1 %v1144_v35 }
 0x69f   :  { %v1097_v36 = vpop.f32.mrf.mxu0 }
 0x6a0   :  { %v1098_v37 = vadd.f32 %v1097_v36, %v1029_v26 }
 0x6a2   :  { %v1131_v40 = vmax.f32 %v1098_v37, 0.0 }
 0x6a7   :  { %v1099_v38 = vpop.f32.mrf.mxu0 }
 0x6a8   :  { %v1100_v39 = vadd.f32 %v1099_v38, %v1029_v26 }
 0x6aa   :  { %v1132_v41 = vmax.f32 %v1100_v39, 0.0 }
 0x6ac   :  { %v1145_v42 = vpack.c.bf16 %v1132_v41, %v1131_v40 }
 0x6ae   :  { %1235 = vmatmul.bf16.gmra.mxu1 %v1145_v42 }
 0x6af   :  { %v1102_v43 = vpop.f32.mrf.mxu0 }
 0x6b0   :  { %v1103_v44 = vadd.f32 %v1102_v43, %v1029_v26 }
 0x6b2   :  { %v1133_v48 = vmax.f32 %v1103_v44, 0.0 }
 0x6b7   :  { %v1104_v45 = vpop.f32.mrf.mxu0 }
 0x6b8   :  { %v1105_v47 = vadd.f32 %v1104_v45, %v1029_v26 }
 0x6ba   :  { %v1134_v49 = vmax.f32 %v1105_v47, 0.0 }
 0x6bc   :  { %v1146_v50 = vpack.c.bf16 %v1134_v49, %v1133_v48 }
 0x6be   :  { %1240 = vmatmul.bf16.gmra.mxu1 %v1146_v50 }
 0x6bf   :  { %v1107_v51 = vpop.f32.mrf.mxu0 }
 0x6c0   :  { %v1108_v52 = vadd.f32 %v1107_v51, %v1029_v26 }
 0x6c2   :  { %v1135_v55 = vmax.f32 %v1108_v52, 0.0 }
 0x6c7   :  { %v1109_v53 = vpop.f32.mrf.mxu0 }
 0x6c8   :  { %v1110_v54 = vadd.f32 %v1109_v53, %v1029_v26 }
 0x6ca   :  { %v1136_v56 = vmax.f32 %v1110_v54, 0.0 }
 0x6cc   :  { %v1147_v57 = vpack.c.bf16 %v1136_v56, %v1135_v55 }
 0x6ce   :  { %1245 = vmatmul.bf16.gmra.mxu1 %v1147_v57 }
 0x6cf   :  { %v1112_v63 = vpop.f32.mrf.mxu0 }
 0x6d0   :  { %v1113_v0 = vadd.f32 %v1112_v63, %v1029_v26 }
 0x6d2   :  { %v1137_v6 = vmax.f32 %v1113_v0, 0.0 }
 0x6d7   :  { %v1114_v1 = vpop.f32.mrf.mxu0 }
 0x6d8   :  { %v1115_v3 = vadd.f32 %v1114_v1, %v1029_v26 }
 0x6da   :  { %v1138_v46 = vmax.f32 %v1115_v3, 0.0 }
 0x6dc   :  { %v1148_v7 = vpack.c.bf16 %v1138_v46, %v1137_v6 }
 0x6de   :  { %1250 = vmatmul.bf16.gmra.mxu1 %v1148_v7 }
 0x6df   :  { %v1117_v8 = vpop.f32.mrf.mxu0 }
 0x6e0   :  { %v1118_v9 = vadd.f32 %v1117_v8, %v1029_v26 }
 0x6e2   :  { %v1139_v13 = vmax.f32 %v1118_v9, 0.0 }
 0x6e7   :  { %v1119_v10 = vpop.f32.mrf.mxu0 }
 0x6e8   :  { %v1120_v12 = vadd.f32 %v1119_v10, %v1029_v26 }
 0x6ea   :  { %v1140_v14 = vmax.f32 %v1120_v12, 0.0 }
 0x6ec   :  { %v1149_v15 = vpack.c.bf16 %v1140_v14, %v1139_v13 }
 0x6ee   :  { %1255 = vmatmul.bf16.gmra.mxu1 %v1149_v15 }
 0x6ef   :  { %v1122_v16 = vpop.f32.mrf.mxu0 }
 0x6f0   :  { %v1123_v17 = vadd.f32 %v1122_v16, %v1029_v26 }
 0x6f2   :  { %v1141_v59 = vmax.f32 %v1123_v17, 0.0 }
 0x6f7   :  { %v1124_v18 = vpop.f32.mrf.mxu0 }
 0x6f8   :  { %v1125_v58 = vadd.f32 %v1124_v18, %v1029_v26 }
 0x6fa   :  { %v1142_v61 = vmax.f32 %v1125_v58, 0.0 }
 0x6fc   :  { %v1150_v2 = vpack.c.bf16 %v1142_v61, %v1141_v59 }
 0x6fe   :  { %1260 = vmatmul.bf16.gmra.mxu1 %v1150_v2 }
 0x70b   :  { %v1226_v62 = vpop.f32.mrf.mxu1 }
 0x70c   :  { %v1227_v20 = vadd.f32 %v1226_v62, %v1168_v60 }
 0x70e   :  { %1266 = vst [vmem:[%s2164_s4] sm:$0xff] %v1227_v20 }
 0x713   :  { %v1228_v4 = vpop.f32.mrf.mxu1 }
 0x714   :  { %v1229_v22 = vadd.f32 %v1228_v4, %v1168_v60 }
 0x716   :  { %1267 = vst [vmem:[%s2164_s4 + $0x8] sm:$0xff] %v1229_v22 }
 0x71b   :  { %v1231_v23 = vpop.f32.mrf.mxu1 }
 0x71c   :  { %v1232_v19 = vadd.f32 %v1231_v23, %v1168_v60 }
 0x71e   :  { %1268 = vst [vmem:[%s2164_s4 + $0x10] sm:$0xff] %v1232_v19 }
 0x723   :  { %v1233_v26 = vpop.f32.mrf.mxu1 }
 0x724   :  { %v1234_v25 = vadd.f32 %v1233_v26, %v1168_v60 }
 0x726   :  { %1269 = vst [vmem:[%s2164_s4 + $0x18] sm:$0xff] %v1234_v25 }
 0x72b   :  { %v1236_v21 = vpop.f32.mrf.mxu1 }
 0x72c   :  { %v1237_v27 = vadd.f32 %v1236_v21, %v1168_v60 }
 0x72e   :  { %1270 = vst [vmem:[%s2164_s4 + $0x20] sm:$0xff] %v1237_v27 }
 0x733   :  { %v1238_v11 = vpop.f32.mrf.mxu1 }
 0x734   :  { %v1239_v5 = vadd.f32 %v1238_v11, %v1168_v60 }
 0x736   :  { %1271 = vst [vmem:[%s2164_s4 + $0x28] sm:$0xff] %v1239_v5 }
 0x73b   :  { %v1241_v28 = vpop.f32.mrf.mxu1 }
 0x73c   :  { %v1242_v30 = vadd.f32 %v1241_v28, %v1168_v60 }
 0x73e   :  { %1272 = vst [vmem:[%s2164_s4 + $0x30] sm:$0xff] %v1242_v30 }
 0x743   :  { %v1243_v24 = vpop.f32.mrf.mxu1 }
 0x744   :  { %v1244_v31 = vadd.f32 %v1243_v24, %v1168_v60 }
 0x746   :  { %1273 = vst [vmem:[%s2164_s4 + $0x38] sm:$0xff] %v1244_v31 }
 0x74b   :  { %v1246_v32 = vpop.f32.mrf.mxu1 }
 0x74c   :  { %v1247_v33 = vadd.f32 %v1246_v32, %v1168_v60 }
 0x74e   :  { %1274 = vst [vmem:[%s2164_s4 + $0x40] sm:$0xff] %v1247_v33 }
 0x753   :  { %v1248_v34 = vpop.f32.mrf.mxu1 }
 0x754   :  { %v1249_v29 = vadd.f32 %v1248_v34, %v1168_v60 }
 0x756   :  { %1275 = vst [vmem:[%s2164_s4 + $0x48] sm:$0xff] %v1249_v29 }
 0x75b   :  { %v1251_v35 = vpop.f32.mrf.mxu1 }
 0x75c   :  { %v1252_v36 = vadd.f32 %v1251_v35, %v1168_v60 }
 0x75e   :  { %1276 = vst [vmem:[%s2164_s4 + $0x50] sm:$0xff] %v1252_v36 }
 0x763   :  { %v1253_v37 = vpop.f32.mrf.mxu1 }
 0x764   :  { %v1254_v38 = vadd.f32 %v1253_v37, %v1168_v60 }
 0x766   :  { %1277 = vst [vmem:[%s2164_s4 + $0x58] sm:$0xff] %v1254_v38 }
 0x76b   :  { %v1256_v39 = vpop.f32.mrf.mxu1 }
 0x76c   :  { %v1257_v40 = vadd.f32 %v1256_v39, %v1168_v60 }
 0x76e   :  { %1278 = vst [vmem:[%s2164_s4 + $0x60] sm:$0xff] %v1257_v40 }
 0x773   :  { %v1258_v41 = vpop.f32.mrf.mxu1 }
 0x774   :  { %v1259_v42 = vadd.f32 %v1258_v41, %v1168_v60 }
 0x776   :  { %1279 = vst [vmem:[%s2164_s4 + $0x68] sm:$0xff] %v1259_v42 }
 0x77b   :  { %v1261_v43 = vpop.f32.mrf.mxu1 }
 0x77c   :  { %v1262_v44 = vadd.f32 %v1261_v43, %v1168_v60 }
 0x77e   :  { %1280 = vst [vmem:[%s2164_s4 + $0x70] sm:$0xff] %v1262_v44 }
 0x783   :  { %v1263_v45 = vpop.f32.mrf.mxu1 }
 0x784   :  { %v1264_v47 = vadd.f32 %v1263_v45, %v1168_v60 }
 0x786   :  { %1281 = vst [vmem:[%s2164_s4 + $0x78] sm:$0xff] %v1264_v47 }

</bundles_post_ra>
